<compile_context>
chip_gen: v7x
topology: tpu7x:2x2x1
jax: 0.10.0
libtpu: 0.0.40
codegen_flags: <defaults>
</compile_context>

<pallas_src>
import functools

import numpy as np
import jax
import jax.numpy as jnp
from jax.experimental import pallas as pl
from jax.experimental.pallas import tpu as pltpu


# ----------------------------------------------------------------------------
# Host-side parameter construction (deterministic, mirrors pywt 'morl' math)
# ----------------------------------------------------------------------------

def _central_frequency_morl(precision=8):
    """Replicates pywt.central_frequency('morl') (== 0.8125)."""
    n = 2 ** precision
    x = np.linspace(-8.0, 8.0, n)
    psi = np.exp(-x ** 2 / 2.0) * np.cos(5.0 * x)
    domain = float(x[-1] - x[0])
    index = int(np.argmax(np.abs(np.fft.fft(psi)[1:]))) + 2
    if index > len(psi) / 2:
        index = len(psi) - index + 2
    return 1.0 / (domain / (index - 1))


def _morl_int_psi(precision=10):
    """Integrated Morlet wavelet, as pywt.cwt uses internally (precision=10)."""
    n = 2 ** precision
    xg = np.linspace(-8.0, 8.0, n)
    psi = np.exp(-xg ** 2 / 2.0) * np.cos(5.0 * xg)
    step = xg[1] - xg[0]
    int_psi = np.cumsum(psi) * step
    return int_psi, xg


def _resampled_filter(scale, int_psi, xg):
    """int_psi resampled at `scale`, reversed -- the conv filter pywt.cwt builds."""
    step = xg[1] - xg[0]
    j = np.arange(scale * (xg[-1] - xg[0]) + 1) / (scale * step)
    j = j.astype(int)
    j = j[j < int_psi.size]
    return int_psi[j][::-1]


def build_wavelet_operators(sfreq, T, dtype=jnp.bfloat16):
    """Per-band linear operators (3, S_max, T_in, T_out) (zero-padded) + counts."""
    freqs = np.linspace(1, 100, 150)
    fc = _central_frequency_morl(precision=8)
    scales = fc * sfreq / freqs
    int_psi, xg = _morl_int_psi(precision=10)

    band_edges = np.arange(0, 101, 4)
    band_scale_idx = []
    for b in range(3):                      # only Delta/Theta/Alpha are used
        fmin, fmax = band_edges[b], band_edges[b + 1]
        band_scale_idx.append(np.where((freqs >= fmin) & (freqs < fmax))[0])
    counts = tuple(int(len(ix)) for ix in band_scale_idx)
    assert min(counts) >= 1
    s_max = max(counts)

    wt = np.zeros((3, s_max, T, T), dtype=np.float64)   # (band, scale, tau_in, t_out)
    for b, idx in enumerate(band_scale_idx):
        cnt = max(len(idx), 1)
        for k, fi in enumerate(idx):
            scale = scales[fi]
            h = _resampled_filter(scale, int_psi, xg)
            L = len(h)
            # coef[t] = -sqrt(scale) * (conv[t+off+1] - conv[t+off]); conv = full conv.
            # => W[tau, t] = -sqrt(scale) * G[t + off + 1 - tau], G[m] = h[m] - h[m-1]
            G = np.zeros(L + 1)
            G[:L] = h
            G[1:] -= h
            off = (L - 2) // 2               # == floor((len(diff(conv)) - T)/2)
            t_out = np.arange(T)[None, :]
            tau = np.arange(T)[:, None]
            m = t_out + off + 1 - tau
            valid = (m >= 0) & (m <= L)
            w = np.where(valid, -np.sqrt(scale) * G[np.clip(m, 0, L)], 0.0)
            # fold the (positive) band-mean weight into the operator
            wt[b, k] = w / cnt
    # TODO(synk): for large T exploit the banded support of W_s (width ~ filter
    # length L(scale)): store cropped (T, L_pad) bands to cut W DMA and MXU work;
    # dense TxT is fine at demo sizes and with the T_out column tiling below.
    return jnp.asarray(wt, dtype=dtype), counts


# ----------------------------------------------------------------------------
# Pallas kernel
# ----------------------------------------------------------------------------

def _wavelet_band_kernel(wt_ref, x_ref, o_ref, *, scale_counts):
    """One grid step = (band, col-tile, row-tile):  o = sum_s |x @ W[band, s]|.

    wt_ref: (S_max, T_in, tile_t) bf16 (zero-padded scales are skipped via pl.when)
    x_ref : (rows, T_in)   bf16
    o_ref : (rows, tile_t) f32   -- used directly as the accumulator
    """
    x = x_ref[...]
    s_max = wt_ref.shape[0]
    min_cnt = min(scale_counts)
    band = pl.program_id(0)

    # Accumulate straight into the resident output block (bounds live ranges; no
    # Python-level value chain across the unrolled dots).
    o_ref[...] = jnp.abs(jnp.dot(x, wt_ref[0], preferred_element_type=jnp.float32))
    for si in range(1, s_max):                      # static, fully unrolled (<= 6)
        if si < min_cnt:
            o_ref[...] += jnp.abs(
                jnp.dot(x, wt_ref[si], preferred_element_type=jnp.float32))
        else:
            # This scale index only exists for some bands; skip the padded matmul.
            active = [bi for bi, c in enumerate(scale_counts) if c > si]
            if not active:
                continue
            cond = band == active[0]
            for bi in active[1:]:
                cond = jnp.logical_or(cond, band == bi)

            @pl.when(cond)
            def _(si=si):
                o_ref[...] += jnp.abs(
                    jnp.dot(x, wt_ref[si], preferred_element_type=jnp.float32))


# ----------------------------------------------------------------------------
# Tiling / VMEM helpers
# ----------------------------------------------------------------------------

def _vmem_capacity_bytes():
    try:
        info = pltpu.get_tpu_info()
        cap = getattr(info, "vmem_capacity_bytes", None)
        if cap:
            return int(cap)
    except Exception:
        pass
    return 64 << 20          # conservative default: v7x per-TensorCore VMEM


def _pick_row_tile(NC, cap=256):
    """Largest multiple-of-8 divisor of NC, capped (256 maps well to the MXU)."""
    best = 8
    for t in range(8, min(NC, cap) + 1, 8):
        if NC % t == 0:
            best = t
    return best


def _pick_col_tile(T, s_max, tile_nc, wt_isz, x_isz, budget):
    """Largest multiple-of-128 divisor of T whose per-step VMEM fits the budget."""
    def need_for(tile_t):
        return (s_max * T * tile_t * wt_isz            # W block, single-buffered
                + 2 * tile_nc * T * x_isz              # x block, double-buffered
                + 2 * tile_nc * tile_t * 4             # f32 out block, double-buffered
                + (2 << 20))                           # headroom / internal scratch

    for tile_t in range(T, 127, -128):
        if T % tile_t != 0:
            continue
        need = need_for(tile_t)
        if need <= budget:
            return tile_t, need
    # TODO(synk): at very large T also shrink tile_nc / use banded W storage; the
    # caller clamps vmem_limit below physical capacity regardless.
    return 128, need_for(128)


# ----------------------------------------------------------------------------
# Wrapper
# ----------------------------------------------------------------------------

def wavelet_transform_3channel(x, wt_banded, scale_counts):
    """x: (N, Chans, Samples) -> (N, 3, Chans, Samples) float32."""
    N, C, T = x.shape
    nb, s_max, t_in, t_out = wt_banded.shape
    assert nb == 3 and t_in == T and t_out == T
    NC = N * C
    assert NC % 8 == 0 and T % 128 == 0, "demo shapes chosen TPU-tile aligned"

    x2 = x.reshape(NC, T).astype(wt_banded.dtype)       # bf16 signals

    wt_isz = np.dtype(wt_banded.dtype).itemsize
    x_isz = wt_isz

    vmem_cap = _vmem_capacity_bytes()
    # Stay well below physical VMEM (v7x: 64 MiB -> ~48 MiB budget; v5e/v6e: 96 MiB).
    budget = max(32 << 20, int(vmem_cap * 0.75))

    tile_nc = _pick_row_tile(NC)
    tile_t, need = _pick_col_tile(T, s_max, tile_nc, wt_isz, x_isz, budget)
    vmem_limit = int(min(vmem_cap - (4 << 20), max(32 << 20, need)))

    n_col = T // tile_t
    n_row = NC // tile_nc
    # Band OUTERMOST, row tiles INNERMOST: the W block index is unchanged across all
    # row tiles, so Pallas fetches each band's operator stack once (per column tile).
    grid = (3, n_col, n_row)

    kernel = functools.partial(_wavelet_band_kernel,
                               scale_counts=tuple(int(c) for c in scale_counts))

    def _build(single_buffer_w, dim_sem):
        wt_kwargs = {}
        if single_buffer_w and hasattr(pl, "Buffered"):
            # W changes only at band/column boundaries: single-buffer it to halve
            # the largest VMEM resident.
            wt_kwargs["pipeline_mode"] = pl.Buffered(1)
        in_specs = [
            pl.BlockSpec((None, s_max, T, tile_t),
                         lambda b, j, i: (b, 0, 0, j), **wt_kwargs),
            pl.BlockSpec((tile_nc, T), lambda b, j, i: (i, 0)),
        ]
        out_specs = pl.BlockSpec((None, tile_nc, tile_t), lambda b, j, i: (b, i, j))
        return pl.pallas_call(
            kernel,
            out_shape=jax.ShapeDtypeStruct((3, NC, T), jnp.float32),
            grid_spec=pltpu.PrefetchScalarGridSpec(
                num_scalar_prefetch=0,
                grid=grid,
                in_specs=in_specs,
                out_specs=out_specs,
            ),
            compiler_params=pltpu.CompilerParams(
                dimension_semantics=dim_sem,
                vmem_limit_bytes=vmem_limit),
        )

    # Config ladder: preferred (single-buffered W, row/col axes parallel for
    # megacore), then progressively more conservative if a combination is rejected.
    configs = [
        dict(single_buffer_w=True, dim_sem=("arbitrary", "parallel", "parallel")),
        dict(single_buffer_w=True, dim_sem=("arbitrary", "arbitrary", "arbitrary")),
        dict(single_buffer_w=False, dim_sem=("arbitrary", "arbitrary", "arbitrary")),
    ]
    out = None
    last_err = None
    for cfg in configs:
        try:
            out = _build(**cfg)(wt_banded, x2)
            out = jax.block_until_ready(out)
            break
        except Exception as e:          # fall back to a more conservative config
            last_err = e
            out = None
    if out is None:
        raise last_err

    # (3, NC, T) -> (N, 3, C, T)
    # TODO(synk): emitting directly in (N, 3, C, T) layout needs 3-D output blocks
    # with (C, T) minor dims plus an in-kernel (rows, T)->(k, C, T) sublane-split
    # reshape, which Mosaic does not reliably lower; the transpose below is the one
    # remaining extra HBM pass over the output.
    return out.reshape(3, N, C, T).transpose(1, 0, 2, 3)


# ----------------------------------------------------------------------------
# References
# ----------------------------------------------------------------------------

def jax_same_math_reference(x, wt_banded):
    """Same bf16 linear-operator math in plain JAX (validates kernel plumbing)."""
    N, C, T = x.shape
    x2 = x.reshape(N * C, T).astype(wt_banded.dtype)
    outs = []
    for b in range(wt_banded.shape[0]):
        acc = jnp.zeros((x2.shape[0], T), jnp.float32)
        for s in range(wt_banded.shape[1]):
            acc = acc + jnp.abs(
                jnp.dot(x2, wt_banded[b, s], preferred_element_type=jnp.float32))
        outs.append(acc)
    out = jnp.stack(outs, axis=0)                     # (3, NC, T)
    return out.reshape(3, N, C, T).transpose(1, 0, 2, 3)


def _reference_cwt_row(sig, scale, int_psi, xg):
    h = _resampled_filter(scale, int_psi, xg)
    conv = np.convolve(sig, h)
    coef = -np.sqrt(scale) * np.diff(conv)
    d = (coef.shape[-1] - sig.shape[-1]) / 2.0
    return coef[int(np.floor(d)): -int(np.ceil(d))]


def reference_forward(x_np, sfreq=500):
    """Pure-numpy mirror of the pywt pipeline (validates module semantics)."""
    N, C, T = x_np.shape
    freqs = np.linspace(1, 100, 150)
    fc = _central_frequency_morl(precision=8)
    scales = fc * sfreq / freqs
    int_psi, xg = _morl_int_psi(precision=10)
    band_edges = np.arange(0, 101, 4)
    out = np.zeros((N, 3, C, T), dtype=np.float64)
    for n in range(N):
        for c in range(C):
            sig = x_np[n, c].astype(np.float64)
            for b in range(3):
                fmin, fmax = band_edges[b], band_edges[b + 1]
                idx = np.where((freqs >= fmin) & (freqs < fmax))[0]
                if len(idx) == 0:
                    continue
                acc = np.zeros(T)
                for fi in idx:
                    acc += np.abs(_reference_cwt_row(sig, scales[fi], int_psi, xg))
                out[n, b, c] = acc / len(idx)
    return out.astype(np.float32)


# ----------------------------------------------------------------------------

if __name__ == "__main__":
    sfreq = 500
    N, C, T = 2, 4, 128          # (batch, EEG channels, samples); NC=8 demo size
    # TODO(synk): at production sizes batch signals so N*Chans >= 128 per row-tile
    # to keep the MXU streamed; demo NC=8 is intentionally tiny.

    key = jax.random.PRNGKey(0)
    x = jax.random.normal(key, (N, C, T), dtype=jnp.float32)
    # Make the input exactly bf16-representable so the only quantization in the
    # kernel path is the bf16 wavelet operators.
    x = x.astype(jnp.bfloat16).astype(jnp.float32)

    wt_banded, scale_counts = build_wavelet_operators(sfreq, T, dtype=jnp.bfloat16)

    out = wavelet_transform_3channel(x, wt_banded, scale_counts)
    out = jax.block_until_ready(out)

    assert out.shape == (N, 3, C, T)
    assert out.dtype == jnp.float32

    # (1) Kernel plumbing check: identical bf16 math in plain JAX (tight tolerance).
    jref = np.asarray(jax.block_until_ready(jax_same_math_reference(x, wt_banded)))
    np.testing.assert_allclose(
        np.asarray(out), jref,
        rtol=1e-3, atol=1e-4 * float(np.abs(jref).max()))

    # (2) Semantics check vs. the pywt-mirror numpy pipeline (absorbs bf16 rounding).
    ref = reference_forward(np.asarray(x), sfreq=sfreq)
    np.testing.assert_allclose(
        np.asarray(out), ref,
        rtol=2e-2, atol=5e-3 * float(np.abs(ref).max()))

    print("KERNEL_OK")
</pallas_src>

<mosaic_0001>
module attributes {stable_mosaic.version = 11 : i64} {
  func.func @_wavelet_band_kernel(%arg0: i32, %arg1: i32, %arg2: i32, %arg3: memref<1x6x128x128xbf16, #tpu.memory_space<vmem>>, %arg4: memref<8x128xbf16, #tpu.memory_space<vmem>>, %arg5: memref<1x8x128xf32, #tpu.memory_space<vmem>>) attributes {dimension_semantics = [#tpu.dimension_semantics<arbitrary>, #tpu.dimension_semantics<parallel>, #tpu.dimension_semantics<parallel>], iteration_bounds = array<i64: 3, 1, 1>, scalar_prefetch = 0 : i64, scratch_operands = 0 : i64, tpu.core_type = #tpu.core_type<tc>, window_params = [{pipeline_mode = #tpu.pipeline_mode<synchronous>, transform_indices = @transform_0, window_bounds = array<i64: 1, 6, 128, 128>}, {transform_indices = @transform_1, window_bounds = array<i64: 8, 128>}, {transform_indices = @transform_2, window_bounds = array<i64: 1, 8, 128>}]} {
    %c0 = arith.constant 0 : index
    %c0_0 = arith.constant 0 : index
    %0 = vector.load %arg4[%c0, %c0_0] : memref<8x128xbf16, #tpu.memory_space<vmem>>, vector<8x128xbf16>
    %c0_1 = arith.constant 0 : index
    %c0_2 = arith.constant 0 : index
    %c0_3 = arith.constant 0 : index
    %c0_4 = arith.constant 0 : index
    %1 = vector.load %arg3[%c0_1, %c0_2, %c0_3, %c0_4] : memref<1x6x128x128xbf16, #tpu.memory_space<vmem>>, vector<1x1x128x128xbf16>
    %2 = vector.shape_cast %1 : vector<1x1x128x128xbf16> to vector<128x128xbf16>
    %cst = arith.constant dense<0.000000e+00> : vector<8x128xf32>
    %3 = tpu.matmul %0, %2, %cst {dimension_numbers = #tpu.dot_dimension_numbers<[1], [0], [0], [1], [0, 0, 1, 1], [], []>} : vector<8x128xbf16>, vector<128x128xbf16>, vector<8x128xf32> -> vector<8x128xf32>
    %4 = math.absf %3 : vector<8x128xf32>
    %c0_5 = arith.constant 0 : index
    %c0_6 = arith.constant 0 : index
    %c0_7 = arith.constant 0 : index
    %5 = vector.load %arg5[%c0_5, %c0_6, %c0_7] : memref<1x8x128xf32, #tpu.memory_space<vmem>>, vector<1x8x128xf32>
    %6 = vector.shape_cast %5 : vector<1x8x128xf32> to vector<8x128xf32>
    %7 = vector.shape_cast %4 : vector<8x128xf32> to vector<1x8x128xf32>
    tpu.vector_store %arg5[%c0_5, %c0_6, %c0_7], %7 {strides = array<i32>} : memref<1x8x128xf32, #tpu.memory_space<vmem>>, vector<1x8x128xf32>,
    %c0_8 = arith.constant 0 : index
    %c0_9 = arith.constant 0 : index
    %c0_10 = arith.constant 0 : index
    %8 = vector.load %arg5[%c0_8, %c0_9, %c0_10] : memref<1x8x128xf32, #tpu.memory_space<vmem>>, vector<1x8x128xf32>
    %9 = vector.shape_cast %8 : vector<1x8x128xf32> to vector<8x128xf32>
    %c0_11 = arith.constant 0 : index
    %c1 = arith.constant 1 : index
    %c0_12 = arith.constant 0 : index
    %c0_13 = arith.constant 0 : index
    %10 = vector.load %arg3[%c0_11, %c1, %c0_12, %c0_13] : memref<1x6x128x128xbf16, #tpu.memory_space<vmem>>, vector<1x1x128x128xbf16>
    %11 = vector.shape_cast %10 : vector<1x1x128x128xbf16> to vector<128x128xbf16>
    %cst_14 = arith.constant dense<0.000000e+00> : vector<8x128xf32>
    %12 = tpu.matmul %0, %11, %cst_14 {dimension_numbers = #tpu.dot_dimension_numbers<[1], [0], [0], [1], [0, 0, 1, 1], [], []>} : vector<8x128xbf16>, vector<128x128xbf16>, vector<8x128xf32> -> vector<8x128xf32>
    %13 = math.absf %12 : vector<8x128xf32>
    %14 = arith.addf %9, %13 : vector<8x128xf32>
    %c0_15 = arith.constant 0 : index
    %c0_16 = arith.constant 0 : index
    %c0_17 = arith.constant 0 : index
    %15 = vector.load %arg5[%c0_15, %c0_16, %c0_17] : memref<1x8x128xf32, #tpu.memory_space<vmem>>, vector<1x8x128xf32>
    %16 = vector.shape_cast %15 : vector<1x8x128xf32> to vector<8x128xf32>
    %17 = vector.shape_cast %14 : vector<8x128xf32> to vector<1x8x128xf32>
    tpu.vector_store %arg5[%c0_15, %c0_16, %c0_17], %17 {strides = array<i32>} : memref<1x8x128xf32, #tpu.memory_space<vmem>>, vector<1x8x128xf32>,
    %c0_18 = arith.constant 0 : index
    %c0_19 = arith.constant 0 : index
    %c0_20 = arith.constant 0 : index
    %18 = vector.load %arg5[%c0_18, %c0_19, %c0_20] : memref<1x8x128xf32, #tpu.memory_space<vmem>>, vector<1x8x128xf32>
    %19 = vector.shape_cast %18 : vector<1x8x128xf32> to vector<8x128xf32>
    %c0_21 = arith.constant 0 : index
    %c2 = arith.constant 2 : index
    %c0_22 = arith.constant 0 : index
    %c0_23 = arith.constant 0 : index
    %20 = vector.load %arg3[%c0_21, %c2, %c0_22, %c0_23] : memref<1x6x128x128xbf16, #tpu.memory_space<vmem>>, vector<1x1x128x128xbf16>
    %21 = vector.shape_cast %20 : vector<1x1x128x128xbf16> to vector<128x128xbf16>
    %cst_24 = arith.constant dense<0.000000e+00> : vector<8x128xf32>
    %22 = tpu.matmul %0, %21, %cst_24 {dimension_numbers = #tpu.dot_dimension_numbers<[1], [0], [0], [1], [0, 0, 1, 1], [], []>} : vector<8x128xbf16>, vector<128x128xbf16>, vector<8x128xf32> -> vector<8x128xf32>
    %23 = math.absf %22 : vector<8x128xf32>
    %24 = arith.addf %19, %23 : vector<8x128xf32>
    %c0_25 = arith.constant 0 : index
    %c0_26 = arith.constant 0 : index
    %c0_27 = arith.constant 0 : index
    %25 = vector.load %arg5[%c0_25, %c0_26, %c0_27] : memref<1x8x128xf32, #tpu.memory_space<vmem>>, vector<1x8x128xf32>
    %26 = vector.shape_cast %25 : vector<1x8x128xf32> to vector<8x128xf32>
    %27 = vector.shape_cast %24 : vector<8x128xf32> to vector<1x8x128xf32>
    tpu.vector_store %arg5[%c0_25, %c0_26, %c0_27], %27 {strides = array<i32>} : memref<1x8x128xf32, #tpu.memory_space<vmem>>, vector<1x8x128xf32>,
    %c0_28 = arith.constant 0 : index
    %c0_29 = arith.constant 0 : index
    %c0_30 = arith.constant 0 : index
    %28 = vector.load %arg5[%c0_28, %c0_29, %c0_30] : memref<1x8x128xf32, #tpu.memory_space<vmem>>, vector<1x8x128xf32>
    %29 = vector.shape_cast %28 : vector<1x8x128xf32> to vector<8x128xf32>
    %c0_31 = arith.constant 0 : index
    %c3 = arith.constant 3 : index
    %c0_32 = arith.constant 0 : index
    %c0_33 = arith.constant 0 : index
    %30 = vector.load %arg3[%c0_31, %c3, %c0_32, %c0_33] : memref<1x6x128x128xbf16, #tpu.memory_space<vmem>>, vector<1x1x128x128xbf16>
    %31 = vector.shape_cast %30 : vector<1x1x128x128xbf16> to vector<128x128xbf16>
    %cst_34 = arith.constant dense<0.000000e+00> : vector<8x128xf32>
    %32 = tpu.matmul %0, %31, %cst_34 {dimension_numbers = #tpu.dot_dimension_numbers<[1], [0], [0], [1], [0, 0, 1, 1], [], []>} : vector<8x128xbf16>, vector<128x128xbf16>, vector<8x128xf32> -> vector<8x128xf32>
    %33 = math.absf %32 : vector<8x128xf32>
    %34 = arith.addf %29, %33 : vector<8x128xf32>
    %c0_35 = arith.constant 0 : index
    %c0_36 = arith.constant 0 : index
    %c0_37 = arith.constant 0 : index
    %35 = vector.load %arg5[%c0_35, %c0_36, %c0_37] : memref<1x8x128xf32, #tpu.memory_space<vmem>>, vector<1x8x128xf32>
    %36 = vector.shape_cast %35 : vector<1x8x128xf32> to vector<8x128xf32>
    %37 = vector.shape_cast %34 : vector<8x128xf32> to vector<1x8x128xf32>
    tpu.vector_store %arg5[%c0_35, %c0_36, %c0_37], %37 {strides = array<i32>} : memref<1x8x128xf32, #tpu.memory_space<vmem>>, vector<1x8x128xf32>,
    %c0_38 = arith.constant 0 : index
    %c0_39 = arith.constant 0 : index
    %c0_40 = arith.constant 0 : index
    %38 = vector.load %arg5[%c0_38, %c0_39, %c0_40] : memref<1x8x128xf32, #tpu.memory_space<vmem>>, vector<1x8x128xf32>
    %39 = vector.shape_cast %38 : vector<1x8x128xf32> to vector<8x128xf32>
    %c0_41 = arith.constant 0 : index
    %c4 = arith.constant 4 : index
    %c0_42 = arith.constant 0 : index
    %c0_43 = arith.constant 0 : index
    %40 = vector.load %arg3[%c0_41, %c4, %c0_42, %c0_43] : memref<1x6x128x128xbf16, #tpu.memory_space<vmem>>, vector<1x1x128x128xbf16>
    %41 = vector.shape_cast %40 : vector<1x1x128x128xbf16> to vector<128x128xbf16>
    %cst_44 = arith.constant dense<0.000000e+00> : vector<8x128xf32>
    %42 = tpu.matmul %0, %41, %cst_44 {dimension_numbers = #tpu.dot_dimension_numbers<[1], [0], [0], [1], [0, 0, 1, 1], [], []>} : vector<8x128xbf16>, vector<128x128xbf16>, vector<8x128xf32> -> vector<8x128xf32>
    %43 = math.absf %42 : vector<8x128xf32>
    %44 = arith.addf %39, %43 : vector<8x128xf32>
    %c0_45 = arith.constant 0 : index
    %c0_46 = arith.constant 0 : index
    %c0_47 = arith.constant 0 : index
    %45 = vector.load %arg5[%c0_45, %c0_46, %c0_47] : memref<1x8x128xf32, #tpu.memory_space<vmem>>, vector<1x8x128xf32>
    %46 = vector.shape_cast %45 : vector<1x8x128xf32> to vector<8x128xf32>
    %47 = vector.shape_cast %44 : vector<8x128xf32> to vector<1x8x128xf32>
    tpu.vector_store %arg5[%c0_45, %c0_46, %c0_47], %47 {strides = array<i32>} : memref<1x8x128xf32, #tpu.memory_space<vmem>>, vector<1x8x128xf32>,
    %c1_i32 = arith.constant 1 : i32
    %48 = arith.cmpi eq, %arg0, %c1_i32 : i32
    %c2_i32 = arith.constant 2 : i32
    %49 = arith.cmpi eq, %arg0, %c2_i32 : i32
    %50 = arith.ori %48, %49 : i1
    %51 = arith.extui %50 : i1 to i32
    %c0_i32 = arith.constant 0 : i32
    %52 = arith.cmpi ne, %51, %c0_i32 : i32
    scf.if %52 {
      %c0_48 = arith.constant 0 : index
      %c0_49 = arith.constant 0 : index
      %c0_50 = arith.constant 0 : index
      %53 = vector.load %arg5[%c0_48, %c0_49, %c0_50] : memref<1x8x128xf32, #tpu.memory_space<vmem>>, vector<1x8x128xf32>
      %54 = vector.shape_cast %53 : vector<1x8x128xf32> to vector<8x128xf32>
      %c0_51 = arith.constant 0 : index
      %c5 = arith.constant 5 : index
      %c0_52 = arith.constant 0 : index
      %c0_53 = arith.constant 0 : index
      %55 = vector.load %arg3[%c0_51, %c5, %c0_52, %c0_53] : memref<1x6x128x128xbf16, #tpu.memory_space<vmem>>, vector<1x1x128x128xbf16>
      %56 = vector.shape_cast %55 : vector<1x1x128x128xbf16> to vector<128x128xbf16>
      %cst_54 = arith.constant dense<0.000000e+00> : vector<8x128xf32>
      %57 = tpu.matmul %0, %56, %cst_54 {dimension_numbers = #tpu.dot_dimension_numbers<[1], [0], [0], [1], [0, 0, 1, 1], [], []>} : vector<8x128xbf16>, vector<128x128xbf16>, vector<8x128xf32> -> vector<8x128xf32>
      %58 = math.absf %57 : vector<8x128xf32>
      %59 = arith.addf %54, %58 : vector<8x128xf32>
      %c0_55 = arith.constant 0 : index
      %c0_56 = arith.constant 0 : index
      %c0_57 = arith.constant 0 : index
      %60 = vector.load %arg5[%c0_55, %c0_56, %c0_57] : memref<1x8x128xf32, #tpu.memory_space<vmem>>, vector<1x8x128xf32>
      %61 = vector.shape_cast %60 : vector<1x8x128xf32> to vector<8x128xf32>
      %62 = vector.shape_cast %59 : vector<8x128xf32> to vector<1x8x128xf32>
      tpu.vector_store %arg5[%c0_55, %c0_56, %c0_57], %62 {strides = array<i32>} : memref<1x8x128xf32, #tpu.memory_space<vmem>>, vector<1x8x128xf32>,
    } else {
    }
    return
  }
  func.func @transform_0(%arg0: i32, %arg1: i32, %arg2: i32) -> (i32, i32, i32, i32) {
    %c0_i32 = arith.constant 0 : i32
    %c0_i32_0 = arith.constant 0 : i32
    %c0_i32_1 = arith.constant 0 : i32
    return %arg0, %c0_i32, %c0_i32_0, %arg1 : i32, i32, i32, i32
  }
  func.func @transform_1(%arg0: i32, %arg1: i32, %arg2: i32) -> (i32, i32) {
    %c0_i32 = arith.constant 0 : i32
    %c0_i32_0 = arith.constant 0 : i32
    return %arg2, %c0_i32 : i32, i32
  }
  func.func @transform_2(%arg0: i32, %arg1: i32, %arg2: i32) -> (i32, i32, i32) {
    %c0_i32 = arith.constant 0 : i32
    return %arg0, %arg2, %arg1 : i32, i32, i32
  }
}

module attributes {stable_mosaic.version = 11 : i64} {
  func.func @_wavelet_band_kernel(%arg0: i32, %arg1: i32, %arg2: i32, %arg3: memref<1x6x128x128xbf16, #tpu.memory_space<vmem>>, %arg4: memref<8x128xbf16, #tpu.memory_space<vmem>>, %arg5: memref<1x8x128xf32, #tpu.memory_space<vmem>>) attributes {dimension_semantics = [#tpu.dimension_semantics<arbitrary>, #tpu.dimension_semantics<arbitrary>, #tpu.dimension_semantics<arbitrary>], iteration_bounds = array<i64: 3, 1, 1>, scalar_prefetch = 0 : i64, scratch_operands = 0 : i64, tpu.core_type = #tpu.core_type<tc>, window_params = [{pipeline_mode = #tpu.pipeline_mode<synchronous>, transform_indices = @transform_0, window_bounds = array<i64: 1, 6, 128, 128>}, {transform_indices = @transform_1, window_bounds = array<i64: 8, 128>}, {transform_indices = @transform_2, window_bounds = array<i64: 1, 8, 128>}]} {
    %c0 = arith.constant 0 : index
    %c0_0 = arith.constant 0 : index
    %0 = vector.load %arg4[%c0, %c0_0] : memref<8x128xbf16, #tpu.memory_space<vmem>>, vector<8x128xbf16>
    %c0_1 = arith.constant 0 : index
    %c0_2 = arith.constant 0 : index
    %c0_3 = arith.constant 0 : index
    %c0_4 = arith.constant 0 : index
    %1 = vector.load %arg3[%c0_1, %c0_2, %c0_3, %c0_4] : memref<1x6x128x128xbf16, #tpu.memory_space<vmem>>, vector<1x1x128x128xbf16>
    %2 = vector.shape_cast %1 : vector<1x1x128x128xbf16> to vector<128x128xbf16>
    %cst = arith.constant dense<0.000000e+00> : vector<8x128xf32>
    %3 = tpu.matmul %0, %2, %cst {dimension_numbers = #tpu.dot_dimension_numbers<[1], [0], [0], [1], [0, 0, 1, 1], [], []>} : vector<8x128xbf16>, vector<128x128xbf16>, vector<8x128xf32> -> vector<8x128xf32>
    %4 = math.absf %3 : vector<8x128xf32>
    %c0_5 = arith.constant 0 : index
    %c0_6 = arith.constant 0 : index
    %c0_7 = arith.constant 0 : index
    %5 = vector.load %arg5[%c0_5, %c0_6, %c0_7] : memref<1x8x128xf32, #tpu.memory_space<vmem>>, vector<1x8x128xf32>
    %6 = vector.shape_cast %5 : vector<1x8x128xf32> to vector<8x128xf32>
    %7 = vector.shape_cast %4 : vector<8x128xf32> to vector<1x8x128xf32>
    tpu.vector_store %arg5[%c0_5, %c0_6, %c0_7], %7 {strides = array<i32>} : memref<1x8x128xf32, #tpu.memory_space<vmem>>, vector<1x8x128xf32>,
    %c0_8 = arith.constant 0 : index
    %c0_9 = arith.constant 0 : index
    %c0_10 = arith.constant 0 : index
    %8 = vector.load %arg5[%c0_8, %c0_9, %c0_10] : memref<1x8x128xf32, #tpu.memory_space<vmem>>, vector<1x8x128xf32>
    %9 = vector.shape_cast %8 : vector<1x8x128xf32> to vector<8x128xf32>
    %c0_11 = arith.constant 0 : index
    %c1 = arith.constant 1 : index
    %c0_12 = arith.constant 0 : index
    %c0_13 = arith.constant 0 : index
    %10 = vector.load %arg3[%c0_11, %c1, %c0_12, %c0_13] : memref<1x6x128x128xbf16, #tpu.memory_space<vmem>>, vector<1x1x128x128xbf16>
    %11 = vector.shape_cast %10 : vector<1x1x128x128xbf16> to vector<128x128xbf16>
    %cst_14 = arith.constant dense<0.000000e+00> : vector<8x128xf32>
    %12 = tpu.matmul %0, %11, %cst_14 {dimension_numbers = #tpu.dot_dimension_numbers<[1], [0], [0], [1], [0, 0, 1, 1], [], []>} : vector<8x128xbf16>, vector<128x128xbf16>, vector<8x128xf32> -> vector<8x128xf32>
    %13 = math.absf %12 : vector<8x128xf32>
    %14 = arith.addf %9, %13 : vector<8x128xf32>
    %c0_15 = arith.constant 0 : index
    %c0_16 = arith.constant 0 : index
    %c0_17 = arith.constant 0 : index
    %15 = vector.load %arg5[%c0_15, %c0_16, %c0_17] : memref<1x8x128xf32, #tpu.memory_space<vmem>>, vector<1x8x128xf32>
    %16 = vector.shape_cast %15 : vector<1x8x128xf32> to vector<8x128xf32>
    %17 = vector.shape_cast %14 : vector<8x128xf32> to vector<1x8x128xf32>
    tpu.vector_store %arg5[%c0_15, %c0_16, %c0_17], %17 {strides = array<i32>} : memref<1x8x128xf32, #tpu.memory_space<vmem>>, vector<1x8x128xf32>,
    %c0_18 = arith.constant 0 : index
    %c0_19 = arith.constant 0 : index
    %c0_20 = arith.constant 0 : index
    %18 = vector.load %arg5[%c0_18, %c0_19, %c0_20] : memref<1x8x128xf32, #tpu.memory_space<vmem>>, vector<1x8x128xf32>
    %19 = vector.shape_cast %18 : vector<1x8x128xf32> to vector<8x128xf32>
    %c0_21 = arith.constant 0 : index
    %c2 = arith.constant 2 : index
    %c0_22 = arith.constant 0 : index
    %c0_23 = arith.constant 0 : index
    %20 = vector.load %arg3[%c0_21, %c2, %c0_22, %c0_23] : memref<1x6x128x128xbf16, #tpu.memory_space<vmem>>, vector<1x1x128x128xbf16>
    %21 = vector.shape_cast %20 : vector<1x1x128x128xbf16> to vector<128x128xbf16>
    %cst_24 = arith.constant dense<0.000000e+00> : vector<8x128xf32>
    %22 = tpu.matmul %0, %21, %cst_24 {dimension_numbers = #tpu.dot_dimension_numbers<[1], [0], [0], [1], [0, 0, 1, 1], [], []>} : vector<8x128xbf16>, vector<128x128xbf16>, vector<8x128xf32> -> vector<8x128xf32>
    %23 = math.absf %22 : vector<8x128xf32>
    %24 = arith.addf %19, %23 : vector<8x128xf32>
    %c0_25 = arith.constant 0 : index
    %c0_26 = arith.constant 0 : index
    %c0_27 = arith.constant 0 : index
    %25 = vector.load %arg5[%c0_25, %c0_26, %c0_27] : memref<1x8x128xf32, #tpu.memory_space<vmem>>, vector<1x8x128xf32>
    %26 = vector.shape_cast %25 : vector<1x8x128xf32> to vector<8x128xf32>
    %27 = vector.shape_cast %24 : vector<8x128xf32> to vector<1x8x128xf32>
    tpu.vector_store %arg5[%c0_25, %c0_26, %c0_27], %27 {strides = array<i32>} : memref<1x8x128xf32, #tpu.memory_space<vmem>>, vector<1x8x128xf32>,
    %c0_28 = arith.constant 0 : index
    %c0_29 = arith.constant 0 : index
    %c0_30 = arith.constant 0 : index
    %28 = vector.load %arg5[%c0_28, %c0_29, %c0_30] : memref<1x8x128xf32, #tpu.memory_space<vmem>>, vector<1x8x128xf32>
    %29 = vector.shape_cast %28 : vector<1x8x128xf32> to vector<8x128xf32>
    %c0_31 = arith.constant 0 : index
    %c3 = arith.constant 3 : index
    %c0_32 = arith.constant 0 : index
    %c0_33 = arith.constant 0 : index
    %30 = vector.load %arg3[%c0_31, %c3, %c0_32, %c0_33] : memref<1x6x128x128xbf16, #tpu.memory_space<vmem>>, vector<1x1x128x128xbf16>
    %31 = vector.shape_cast %30 : vector<1x1x128x128xbf16> to vector<128x128xbf16>
    %cst_34 = arith.constant dense<0.000000e+00> : vector<8x128xf32>
    %32 = tpu.matmul %0, %31, %cst_34 {dimension_numbers = #tpu.dot_dimension_numbers<[1], [0], [0], [1], [0, 0, 1, 1], [], []>} : vector<8x128xbf16>, vector<128x128xbf16>, vector<8x128xf32> -> vector<8x128xf32>
    %33 = math.absf %32 : vector<8x128xf32>
    %34 = arith.addf %29, %33 : vector<8x128xf32>
    %c0_35 = arith.constant 0 : index
    %c0_36 = arith.constant 0 : index
    %c0_37 = arith.constant 0 : index
    %35 = vector.load %arg5[%c0_35, %c0_36, %c0_37] : memref<1x8x128xf32, #tpu.memory_space<vmem>>, vector<1x8x128xf32>
    %36 = vector.shape_cast %35 : vector<1x8x128xf32> to vector<8x128xf32>
    %37 = vector.shape_cast %34 : vector<8x128xf32> to vector<1x8x128xf32>
    tpu.vector_store %arg5[%c0_35, %c0_36, %c0_37], %37 {strides = array<i32>} : memref<1x8x128xf32, #tpu.memory_space<vmem>>, vector<1x8x128xf32>,
    %c0_38 = arith.constant 0 : index
    %c0_39 = arith.constant 0 : index
    %c0_40 = arith.constant 0 : index
    %38 = vector.load %arg5[%c0_38, %c0_39, %c0_40] : memref<1x8x128xf32, #tpu.memory_space<vmem>>, vector<1x8x128xf32>
    %39 = vector.shape_cast %38 : vector<1x8x128xf32> to vector<8x128xf32>
    %c0_41 = arith.constant 0 : index
    %c4 = arith.constant 4 : index
    %c0_42 = arith.constant 0 : index
    %c0_43 = arith.constant 0 : index
    %40 = vector.load %arg3[%c0_41, %c4, %c0_42, %c0_43] : memref<1x6x128x128xbf16, #tpu.memory_space<vmem>>, vector<1x1x128x128xbf16>
    %41 = vector.shape_cast %40 : vector<1x1x128x128xbf16> to vector<128x128xbf16>
    %cst_44 = arith.constant dense<0.000000e+00> : vector<8x128xf32>
    %42 = tpu.matmul %0, %41, %cst_44 {dimension_numbers = #tpu.dot_dimension_numbers<[1], [0], [0], [1], [0, 0, 1, 1], [], []>} : vector<8x128xbf16>, vector<128x128xbf16>, vector<8x128xf32> -> vector<8x128xf32>
    %43 = math.absf %42 : vector<8x128xf32>
    %44 = arith.addf %39, %43 : vector<8x128xf32>
    %c0_45 = arith.constant 0 : index
    %c0_46 = arith.constant 0 : index
    %c0_47 = arith.constant 0 : index
    %45 = vector.load %arg5[%c0_45, %c0_46, %c0_47] : memref<1x8x128xf32, #tpu.memory_space<vmem>>, vector<1x8x128xf32>
    %46 = vector.shape_cast %45 : vector<1x8x128xf32> to vector<8x128xf32>
    %47 = vector.shape_cast %44 : vector<8x128xf32> to vector<1x8x128xf32>
    tpu.vector_store %arg5[%c0_45, %c0_46, %c0_47], %47 {strides = array<i32>} : memref<1x8x128xf32, #tpu.memory_space<vmem>>, vector<1x8x128xf32>,
    %c1_i32 = arith.constant 1 : i32
    %48 = arith.cmpi eq, %arg0, %c1_i32 : i32
    %c2_i32 = arith.constant 2 : i32
    %49 = arith.cmpi eq, %arg0, %c2_i32 : i32
    %50 = arith.ori %48, %49 : i1
    %51 = arith.extui %50 : i1 to i32
    %c0_i32 = arith.constant 0 : i32
    %52 = arith.cmpi ne, %51, %c0_i32 : i32
    scf.if %52 {
      %c0_48 = arith.constant 0 : index
      %c0_49 = arith.constant 0 : index
      %c0_50 = arith.constant 0 : index
      %53 = vector.load %arg5[%c0_48, %c0_49, %c0_50] : memref<1x8x128xf32, #tpu.memory_space<vmem>>, vector<1x8x128xf32>
      %54 = vector.shape_cast %53 : vector<1x8x128xf32> to vector<8x128xf32>
      %c0_51 = arith.constant 0 : index
      %c5 = arith.constant 5 : index
      %c0_52 = arith.constant 0 : index
      %c0_53 = arith.constant 0 : index
      %55 = vector.load %arg3[%c0_51, %c5, %c0_52, %c0_53] : memref<1x6x128x128xbf16, #tpu.memory_space<vmem>>, vector<1x1x128x128xbf16>
      %56 = vector.shape_cast %55 : vector<1x1x128x128xbf16> to vector<128x128xbf16>
      %cst_54 = arith.constant dense<0.000000e+00> : vector<8x128xf32>
      %57 = tpu.matmul %0, %56, %cst_54 {dimension_numbers = #tpu.dot_dimension_numbers<[1], [0], [0], [1], [0, 0, 1, 1], [], []>} : vector<8x128xbf16>, vector<128x128xbf16>, vector<8x128xf32> -> vector<8x128xf32>
      %58 = math.absf %57 : vector<8x128xf32>
      %59 = arith.addf %54, %58 : vector<8x128xf32>
      %c0_55 = arith.constant 0 : index
      %c0_56 = arith.constant 0 : index
      %c0_57 = arith.constant 0 : index
      %60 = vector.load %arg5[%c0_55, %c0_56, %c0_57] : memref<1x8x128xf32, #tpu.memory_space<vmem>>, vector<1x8x128xf32>
      %61 = vector.shape_cast %60 : vector<1x8x128xf32> to vector<8x128xf32>
      %62 = vector.shape_cast %59 : vector<8x128xf32> to vector<1x8x128xf32>
      tpu.vector_store %arg5[%c0_55, %c0_56, %c0_57], %62 {strides = array<i32>} : memref<1x8x128xf32, #tpu.memory_space<vmem>>, vector<1x8x128xf32>,
    } else {
    }
    return
  }
  func.func @transform_0(%arg0: i32, %arg1: i32, %arg2: i32) -> (i32, i32, i32, i32) {
    %c0_i32 = arith.constant 0 : i32
    %c0_i32_0 = arith.constant 0 : i32
    %c0_i32_1 = arith.constant 0 : i32
    return %arg0, %c0_i32, %c0_i32_0, %arg1 : i32, i32, i32, i32
  }
  func.func @transform_1(%arg0: i32, %arg1: i32, %arg2: i32) -> (i32, i32) {
    %c0_i32 = arith.constant 0 : i32
    %c0_i32_0 = arith.constant 0 : i32
    return %arg2, %c0_i32 : i32, i32
  }
  func.func @transform_2(%arg0: i32, %arg1: i32, %arg2: i32) -> (i32, i32, i32) {
    %c0_i32 = arith.constant 0 : i32
    return %arg0, %arg2, %arg1 : i32, i32, i32
  }
}

module attributes {stable_mosaic.version = 11 : i64} {
  func.func @_wavelet_band_kernel(%arg0: i32, %arg1: i32, %arg2: i32, %arg3: memref<1x6x128x128xbf16, #tpu.memory_space<vmem>>, %arg4: memref<8x128xbf16, #tpu.memory_space<vmem>>, %arg5: memref<1x8x128xf32, #tpu.memory_space<vmem>>) attributes {dimension_semantics = [#tpu.dimension_semantics<arbitrary>, #tpu.dimension_semantics<arbitrary>, #tpu.dimension_semantics<arbitrary>], iteration_bounds = array<i64: 3, 1, 1>, scalar_prefetch = 0 : i64, scratch_operands = 0 : i64, tpu.core_type = #tpu.core_type<tc>, window_params = [{transform_indices = @transform_0, window_bounds = array<i64: 1, 6, 128, 128>}, {transform_indices = @transform_1, window_bounds = array<i64: 8, 128>}, {transform_indices = @transform_2, window_bounds = array<i64: 1, 8, 128>}]} {
    %c0 = arith.constant 0 : index
    %c0_0 = arith.constant 0 : index
    %0 = vector.load %arg4[%c0, %c0_0] : memref<8x128xbf16, #tpu.memory_space<vmem>>, vector<8x128xbf16>
    %c0_1 = arith.constant 0 : index
    %c0_2 = arith.constant 0 : index
    %c0_3 = arith.constant 0 : index
    %c0_4 = arith.constant 0 : index
    %1 = vector.load %arg3[%c0_1, %c0_2, %c0_3, %c0_4] : memref<1x6x128x128xbf16, #tpu.memory_space<vmem>>, vector<1x1x128x128xbf16>
    %2 = vector.shape_cast %1 : vector<1x1x128x128xbf16> to vector<128x128xbf16>
    %cst = arith.constant dense<0.000000e+00> : vector<8x128xf32>
    %3 = tpu.matmul %0, %2, %cst {dimension_numbers = #tpu.dot_dimension_numbers<[1], [0], [0], [1], [0, 0, 1, 1], [], []>} : vector<8x128xbf16>, vector<128x128xbf16>, vector<8x128xf32> -> vector<8x128xf32>
    %4 = math.absf %3 : vector<8x128xf32>
    %c0_5 = arith.constant 0 : index
    %c0_6 = arith.constant 0 : index
    %c0_7 = arith.constant 0 : index
    %5 = vector.load %arg5[%c0_5, %c0_6, %c0_7] : memref<1x8x128xf32, #tpu.memory_space<vmem>>, vector<1x8x128xf32>
    %6 = vector.shape_cast %5 : vector<1x8x128xf32> to vector<8x128xf32>
    %7 = vector.shape_cast %4 : vector<8x128xf32> to vector<1x8x128xf32>
    tpu.vector_store %arg5[%c0_5, %c0_6, %c0_7], %7 {strides = array<i32>} : memref<1x8x128xf32, #tpu.memory_space<vmem>>, vector<1x8x128xf32>,
    %c0_8 = arith.constant 0 : index
    %c0_9 = arith.constant 0 : index
    %c0_10 = arith.constant 0 : index
    %8 = vector.load %arg5[%c0_8, %c0_9, %c0_10] : memref<1x8x128xf32, #tpu.memory_space<vmem>>, vector<1x8x128xf32>
    %9 = vector.shape_cast %8 : vector<1x8x128xf32> to vector<8x128xf32>
    %c0_11 = arith.constant 0 : index
    %c1 = arith.constant 1 : index
    %c0_12 = arith.constant 0 : index
    %c0_13 = arith.constant 0 : index
    %10 = vector.load %arg3[%c0_11, %c1, %c0_12, %c0_13] : memref<1x6x128x128xbf16, #tpu.memory_space<vmem>>, vector<1x1x128x128xbf16>
    %11 = vector.shape_cast %10 : vector<1x1x128x128xbf16> to vector<128x128xbf16>
    %cst_14 = arith.constant dense<0.000000e+00> : vector<8x128xf32>
    %12 = tpu.matmul %0, %11, %cst_14 {dimension_numbers = #tpu.dot_dimension_numbers<[1], [0], [0], [1], [0, 0, 1, 1], [], []>} : vector<8x128xbf16>, vector<128x128xbf16>, vector<8x128xf32> -> vector<8x128xf32>
    %13 = math.absf %12 : vector<8x128xf32>
    %14 = arith.addf %9, %13 : vector<8x128xf32>
    %c0_15 = arith.constant 0 : index
    %c0_16 = arith.constant 0 : index
    %c0_17 = arith.constant 0 : index
    %15 = vector.load %arg5[%c0_15, %c0_16, %c0_17] : memref<1x8x128xf32, #tpu.memory_space<vmem>>, vector<1x8x128xf32>
    %16 = vector.shape_cast %15 : vector<1x8x128xf32> to vector<8x128xf32>
    %17 = vector.shape_cast %14 : vector<8x128xf32> to vector<1x8x128xf32>
    tpu.vector_store %arg5[%c0_15, %c0_16, %c0_17], %17 {strides = array<i32>} : memref<1x8x128xf32, #tpu.memory_space<vmem>>, vector<1x8x128xf32>,
    %c0_18 = arith.constant 0 : index
    %c0_19 = arith.constant 0 : index
    %c0_20 = arith.constant 0 : index
    %18 = vector.load %arg5[%c0_18, %c0_19, %c0_20] : memref<1x8x128xf32, #tpu.memory_space<vmem>>, vector<1x8x128xf32>
    %19 = vector.shape_cast %18 : vector<1x8x128xf32> to vector<8x128xf32>
    %c0_21 = arith.constant 0 : index
    %c2 = arith.constant 2 : index
    %c0_22 = arith.constant 0 : index
    %c0_23 = arith.constant 0 : index
    %20 = vector.load %arg3[%c0_21, %c2, %c0_22, %c0_23] : memref<1x6x128x128xbf16, #tpu.memory_space<vmem>>, vector<1x1x128x128xbf16>
    %21 = vector.shape_cast %20 : vector<1x1x128x128xbf16> to vector<128x128xbf16>
    %cst_24 = arith.constant dense<0.000000e+00> : vector<8x128xf32>
    %22 = tpu.matmul %0, %21, %cst_24 {dimension_numbers = #tpu.dot_dimension_numbers<[1], [0], [0], [1], [0, 0, 1, 1], [], []>} : vector<8x128xbf16>, vector<128x128xbf16>, vector<8x128xf32> -> vector<8x128xf32>
    %23 = math.absf %22 : vector<8x128xf32>
    %24 = arith.addf %19, %23 : vector<8x128xf32>
    %c0_25 = arith.constant 0 : index
    %c0_26 = arith.constant 0 : index
    %c0_27 = arith.constant 0 : index
    %25 = vector.load %arg5[%c0_25, %c0_26, %c0_27] : memref<1x8x128xf32, #tpu.memory_space<vmem>>, vector<1x8x128xf32>
    %26 = vector.shape_cast %25 : vector<1x8x128xf32> to vector<8x128xf32>
    %27 = vector.shape_cast %24 : vector<8x128xf32> to vector<1x8x128xf32>
    tpu.vector_store %arg5[%c0_25, %c0_26, %c0_27], %27 {strides = array<i32>} : memref<1x8x128xf32, #tpu.memory_space<vmem>>, vector<1x8x128xf32>,
    %c0_28 = arith.constant 0 : index
    %c0_29 = arith.constant 0 : index
    %c0_30 = arith.constant 0 : index
    %28 = vector.load %arg5[%c0_28, %c0_29, %c0_30] : memref<1x8x128xf32, #tpu.memory_space<vmem>>, vector<1x8x128xf32>
    %29 = vector.shape_cast %28 : vector<1x8x128xf32> to vector<8x128xf32>
    %c0_31 = arith.constant 0 : index
    %c3 = arith.constant 3 : index
    %c0_32 = arith.constant 0 : index
    %c0_33 = arith.constant 0 : index
    %30 = vector.load %arg3[%c0_31, %c3, %c0_32, %c0_33] : memref<1x6x128x128xbf16, #tpu.memory_space<vmem>>, vector<1x1x128x128xbf16>
    %31 = vector.shape_cast %30 : vector<1x1x128x128xbf16> to vector<128x128xbf16>
    %cst_34 = arith.constant dense<0.000000e+00> : vector<8x128xf32>
    %32 = tpu.matmul %0, %31, %cst_34 {dimension_numbers = #tpu.dot_dimension_numbers<[1], [0], [0], [1], [0, 0, 1, 1], [], []>} : vector<8x128xbf16>, vector<128x128xbf16>, vector<8x128xf32> -> vector<8x128xf32>
    %33 = math.absf %32 : vector<8x128xf32>
    %34 = arith.addf %29, %33 : vector<8x128xf32>
    %c0_35 = arith.constant 0 : index
    %c0_36 = arith.constant 0 : index
    %c0_37 = arith.constant 0 : index
    %35 = vector.load %arg5[%c0_35, %c0_36, %c0_37] : memref<1x8x128xf32, #tpu.memory_space<vmem>>, vector<1x8x128xf32>
    %36 = vector.shape_cast %35 : vector<1x8x128xf32> to vector<8x128xf32>
    %37 = vector.shape_cast %34 : vector<8x128xf32> to vector<1x8x128xf32>
    tpu.vector_store %arg5[%c0_35, %c0_36, %c0_37], %37 {strides = array<i32>} : memref<1x8x128xf32, #tpu.memory_space<vmem>>, vector<1x8x128xf32>,
    %c0_38 = arith.constant 0 : index
    %c0_39 = arith.constant 0 : index
    %c0_40 = arith.constant 0 : index
    %38 = vector.load %arg5[%c0_38, %c0_39, %c0_40] : memref<1x8x128xf32, #tpu.memory_space<vmem>>, vector<1x8x128xf32>
    %39 = vector.shape_cast %38 : vector<1x8x128xf32> to vector<8x128xf32>
    %c0_41 = arith.constant 0 : index
    %c4 = arith.constant 4 : index
    %c0_42 = arith.constant 0 : index
    %c0_43 = arith.constant 0 : index
    %40 = vector.load %arg3[%c0_41, %c4, %c0_42, %c0_43] : memref<1x6x128x128xbf16, #tpu.memory_space<vmem>>, vector<1x1x128x128xbf16>
    %41 = vector.shape_cast %40 : vector<1x1x128x128xbf16> to vector<128x128xbf16>
    %cst_44 = arith.constant dense<0.000000e+00> : vector<8x128xf32>
    %42 = tpu.matmul %0, %41, %cst_44 {dimension_numbers = #tpu.dot_dimension_numbers<[1], [0], [0], [1], [0, 0, 1, 1], [], []>} : vector<8x128xbf16>, vector<128x128xbf16>, vector<8x128xf32> -> vector<8x128xf32>
    %43 = math.absf %42 : vector<8x128xf32>
    %44 = arith.addf %39, %43 : vector<8x128xf32>
    %c0_45 = arith.constant 0 : index
    %c0_46 = arith.constant 0 : index
    %c0_47 = arith.constant 0 : index
    %45 = vector.load %arg5[%c0_45, %c0_46, %c0_47] : memref<1x8x128xf32, #tpu.memory_space<vmem>>, vector<1x8x128xf32>
    %46 = vector.shape_cast %45 : vector<1x8x128xf32> to vector<8x128xf32>
    %47 = vector.shape_cast %44 : vector<8x128xf32> to vector<1x8x128xf32>
    tpu.vector_store %arg5[%c0_45, %c0_46, %c0_47], %47 {strides = array<i32>} : memref<1x8x128xf32, #tpu.memory_space<vmem>>, vector<1x8x128xf32>,
    %c1_i32 = arith.constant 1 : i32
    %48 = arith.cmpi eq, %arg0, %c1_i32 : i32
    %c2_i32 = arith.constant 2 : i32
    %49 = arith.cmpi eq, %arg0, %c2_i32 : i32
    %50 = arith.ori %48, %49 : i1
    %51 = arith.extui %50 : i1 to i32
    %c0_i32 = arith.constant 0 : i32
    %52 = arith.cmpi ne, %51, %c0_i32 : i32
    scf.if %52 {
      %c0_48 = arith.constant 0 : index
      %c0_49 = arith.constant 0 : index
      %c0_50 = arith.constant 0 : index
      %53 = vector.load %arg5[%c0_48, %c0_49, %c0_50] : memref<1x8x128xf32, #tpu.memory_space<vmem>>, vector<1x8x128xf32>
      %54 = vector.shape_cast %53 : vector<1x8x128xf32> to vector<8x128xf32>
      %c0_51 = arith.constant 0 : index
      %c5 = arith.constant 5 : index
      %c0_52 = arith.constant 0 : index
      %c0_53 = arith.constant 0 : index
      %55 = vector.load %arg3[%c0_51, %c5, %c0_52, %c0_53] : memref<1x6x128x128xbf16, #tpu.memory_space<vmem>>, vector<1x1x128x128xbf16>
      %56 = vector.shape_cast %55 : vector<1x1x128x128xbf16> to vector<128x128xbf16>
      %cst_54 = arith.constant dense<0.000000e+00> : vector<8x128xf32>
      %57 = tpu.matmul %0, %56, %cst_54 {dimension_numbers = #tpu.dot_dimension_numbers<[1], [0], [0], [1], [0, 0, 1, 1], [], []>} : vector<8x128xbf16>, vector<128x128xbf16>, vector<8x128xf32> -> vector<8x128xf32>
      %58 = math.absf %57 : vector<8x128xf32>
      %59 = arith.addf %54, %58 : vector<8x128xf32>
      %c0_55 = arith.constant 0 : index
      %c0_56 = arith.constant 0 : index
      %c0_57 = arith.constant 0 : index
      %60 = vector.load %arg5[%c0_55, %c0_56, %c0_57] : memref<1x8x128xf32, #tpu.memory_space<vmem>>, vector<1x8x128xf32>
      %61 = vector.shape_cast %60 : vector<1x8x128xf32> to vector<8x128xf32>
      %62 = vector.shape_cast %59 : vector<8x128xf32> to vector<1x8x128xf32>
      tpu.vector_store %arg5[%c0_55, %c0_56, %c0_57], %62 {strides = array<i32>} : memref<1x8x128xf32, #tpu.memory_space<vmem>>, vector<1x8x128xf32>,
    } else {
    }
    return
  }
  func.func @transform_0(%arg0: i32, %arg1: i32, %arg2: i32) -> (i32, i32, i32, i32) {
    %c0_i32 = arith.constant 0 : i32
    %c0_i32_0 = arith.constant 0 : i32
    %c0_i32_1 = arith.constant 0 : i32
    return %arg0, %c0_i32, %c0_i32_0, %arg1 : i32, i32, i32, i32
  }
  func.func @transform_1(%arg0: i32, %arg1: i32, %arg2: i32) -> (i32, i32) {
    %c0_i32 = arith.constant 0 : i32
    %c0_i32_0 = arith.constant 0 : i32
    return %arg2, %c0_i32 : i32, i32
  }
  func.func @transform_2(%arg0: i32, %arg1: i32, %arg2: i32) -> (i32, i32, i32) {
    %c0_i32 = arith.constant 0 : i32
    return %arg0, %arg2, %arg1 : i32, i32, i32
  }
}

</mosaic_0001>

<bundles_post_ra>
// kernel: tpu_custom_call.1
= control target key start
LH: loop header
LB: loop body
LE: loop exit
PB: predicated region body
PF: predicated region fallthrough
CT: control target
= control target key end

     0   :  { %7 = vsyncpa [#allocation3], 0  ;;  %s1757_s0 = inlined_call_operand.hbm [shape: bf16[3,6,128,128], index: 0, kind: input, shape index: {}]   ;;  %s1758_s1 = inlined_call_operand.hbm [shape: bf16[8,128], index: 1, kind: input, shape index: {}]   ;;  %s1759_s2 = inlined_call_operand.hbm [shape: f32[3,8,128], index: 2, kind: output, shape index: {}]  }
   0x1   :  { %8 = vsyncpa [#allocation6], 0 }
   0x2   :  { %9 = vsyncpa [#allocation4], 0 }
   0x3   :  { %11 = vsyncpa [#allocation4 + $0x1], 0  ;;  %s1485_s9 = smov 0   ;;  %s1487_s10 = smov 0  }
   0x4   :  { %s1489_s11 = smov 0   ;;  %s1491_s12 = smov 0  }
   0x5   :  { %s1493_s13 = smov 0   ;;  %s1495_s14 = smov 0  }
   0x6 LB: > { %s954_s15 = sadd.s32 4294967295, %s1459_s14   ;;  %s955_s16 = sadd.s32 4294967294, %s1459_s14   ;;  %s1459_s14 = sphi %s1495_s14, %s17_s14   ;;  %s1455_s13 = sphi %s1493_s13, %s1785_s13   ;;  %s1451_s12 = sphi %s1491_s12, %s1784_s12   ;;  %s1447_s11 = sphi %s1489_s11, %s1783_s11   ;;  %s1443_s10 = sphi %s1487_s10, %s1782_s10   ;;  %s1439_s9 = sphi %s1485_s9, %s1781_s9  }
   0x7   : > { %s36_s17 = sadd.s32 1, %s1455_s13  ;;  %s45_s18 = sadd.s32 1, %s1447_s11 }
   0x8   : > { %p38_p0 = scmp.ge.s32.totalorder %s36_s17, 3  ;;  %p58_p1 = scmp.ne.s32.totalorder %s1443_s10, %s1439_s9 }
   0x9   : > { %p1521_p2 = scmp.eq.s32.totalorder %s954_s15, 0  ;;  %p111_p3 = scmp.ne.s32.totalorder %s1447_s11, %s1443_s10 }
   0xa   : > { %s1787_s17 = smov (%p38_p0, %s36_s17), 0  ;;  %p112_p5 = scmp.eq.s32.totalorder %s954_s15, 2 }
   0xb   : > { %s1767_s19 = scalar_select %p1521_p2, 1, 0 }
   0xc   : > { %p1531_p4 = por %p1521_p2, %p58_p1  ;;  %s40_s21 = ssub.s32 %s1455_s13, %s1787_s17 }
   0xd   : > { %p118_p6 = scmp.eq.s32.totalorder %s955_s16, 2  ;;  %p43_p7 = scmp.eq.s32.totalorder %s40_s21, 0 }
   0xe   : > { %s1768_s20 = scalar_select %p1531_p4, 1, 0 }
   0xf   : > { %p1537_p8 = por %p112_p5, %p111_p3  ;;  %p1541_p9 = por %p118_p6, %p58_p1 }
  0x10   : > { %p956_p10 = scmp.ge.s32.totalorder %s1459_s14, 1  ;;  %p125_p11 = scmp.lt.s32.totalorder %s1459_s14, 4 }
  0x11   : > { %s1769_s22 = scalar_select %p1537_p8, 1, 0 }
  0x12   : > { %s1770_s23 = scalar_select %p1541_p9, 1, 0 }
  0x13   : > { %s1547_s24 = scalar_select %p43_p7, %s1447_s11, %s45_s18  }
  0x14   : > { %s1188_s25 = smul.u32 6144, %s1451_s12  ;;  %p1551_p12 = pnand %p956_p10, %p125_p11 }
  0x15   : > { %s1461_s30 = smov [#allocation2]   ;;  %s1462_s5 = smov [#allocation5]  }
  0x16   : > { %s1771_s26 = scalar_select %p1551_p12, 1, 0 }
  0x17   : > { %s1558_s29 = scalar_lea.hbm %s1757_s0, %s1188_s25  ;;  %s141_s3 = sshll.u32 %s1461_s30, 4  ;;  %s1562_s3 = int_to_ptr.vmem [resolvable:$true] %s141_s3 }
  0x18   : > { %p1197_p13 = pneg %p1551_p12  ;;  %s157_s6 = sshll.u32 %s1462_s5, 4  ;;  %s1576_s6 = int_to_ptr.vmem [resolvable:$true] %s157_s6 }
  0x19   : > { %s1315_s8 = scalar_lea.hbm %s1558_s29, 6144  ;;  %s1320_s18 = scalar_lea.hbm %s1757_s0, 18432 }
  0x1a   : > { %p1566_p0 = pnand %p1197_p13, %p1531_p4  ;;  %p1572_p1 = pnand %p1197_p13, %p1521_p2 }
  0x1b   : > { %p1316_p3 = scmp.ne.s32.totalorder %s1558_s29, %s1315_s8  ;;  %p1321_p10 = scmp.lt.u32.totalorder %s1558_s29, %s1757_s0 }
  0x1c   : > { %s1773_s7 = scalar_select %p1572_p1, 1, 0 }
  0x1d   : > { %p1317_p5 = pneg %p1566_p0  ;;  %p1322_p11 = scmp.lt.u32.totalorder %s1320_s18, %s1315_s8 }
  0x1e   : > { %p1324_p9 = scmp.lt.u32.totalorder %s1315_s8, %s1558_s29 }
  0x1f   : > { %p1318_p6 = pnand %p1317_p5, %p1316_p3  ;;  %p1323_p13 = por %p1322_p11, %p1321_p10 }
  0x21   : > { %p1319_p7 = pneg %p1318_p6  ;;  %p1325_p8 = por %p1324_p9, %p1323_p13 }
  0x23   : > { %p1326_p2 = pnand %p1325_p8, %p1319_p7 }
  0x25   : > { %1329 = shalt.err (!%p1326_p2)
}
  0x26   : > { %s1330_s27 = scalar_lea.vmem %s1562_s3, 6144  ;;  %p1338_p12 = scmp.lt.s32.totalorder %s1562_s3, %s1562_s3 }
  0x27   : > { %p1331_p3 = scmp.ne.s32.totalorder %s1562_s3, %s1330_s27  ;;  %p1339_p1 = scmp.lt.s32.totalorder %s1330_s27, %s1330_s27 }
  0x29   : > { %p1333_p6 = pnand %p1331_p3, %p1317_p5  ;;  %p1340_p10 = por %p1339_p1, %p1338_p12 }
  0x2b   : > { %p1334_p4 = pneg %p1333_p6 }
  0x2d   : > { %p1341_p11 = pnand %p1340_p10, %p1334_p4 }
  0x2f   : > { %1344 = shalt.err (!%p1341_p11)
}
  0x30   : > { %s1463_s28 = smov 64   ;;  %s1464_s30 = smov 4  }
  0x31   : > { %1200 = dma.hbm_to_vmem [thread:$0]  (!%p1566_p0), %s1558_s29, 6144, %s1562_s3, [#allocation3], %s1463_s28, %s1463_s28, %s1464_s30  }
  0x32   : > { %s1345_s15 = scalar_lea.hbm %s1758_s1, 64  ;;  %p1774_p8 = scmp.ne.s32.totalorder %s1773_s7, 0 }
  0x33   : > { %p1346_p2 = scmp.ne.s32.totalorder %s1758_s1, %s1345_s15  ;;  %p1352_p1 = scmp.lt.u32.totalorder %s1345_s15, %s1758_s1 }
  0x34   : > { %p1347_p9 = pneg %p1774_p8 }
  0x36   : > { %p1348_p4 = pnand %p1347_p9, %p1346_p2 }
  0x38   : > { %p1349_p12 = pneg %p1348_p4 }
  0x3a   : > { %p1354_p5 = pnand %p1352_p1, %p1349_p12 }
  0x3c   : > { %1357 = shalt.err (!%p1354_p5)
}
  0x3d   : > { %s1358_s29 = scalar_lea.vmem %s1576_s6, 64  ;;  %p1366_p3 = scmp.lt.s32.totalorder %s1576_s6, %s1576_s6 }
  0x3e   : > { %p1359_p0 = scmp.ne.s32.totalorder %s1576_s6, %s1358_s29  ;;  %p1367_p6 = scmp.lt.s32.totalorder %s1358_s29, %s1358_s29 }
  0x40   : > { %p1361_p7 = pnand %p1359_p0, %p1347_p9  ;;  %p1368_p10 = por %p1367_p6, %p1366_p3 }
  0x42   : > { %p1362_p13 = pneg %p1361_p7 }
  0x44   : > { %p1369_p11 = pnand %p1368_p10, %p1362_p13 }
  0x46   : > { %1372 = shalt.err (!%p1369_p11)
}
  0x47   : > { %1203 = dma.hbm_to_vmem [thread:$0]  (!%p1774_p8), %s1758_s1, 64, %s1576_s6, [#allocation6]  }
  0x48   : > { %p1775_p2 = scmp.ne.s32.totalorder %s1771_s26, 0 }
  0x49   : > { %p1776_p4 = scmp.ne.s32.totalorder (!%p1775_p2), %s1768_s20, 0 }
  0x4a   : > { %170 = sbr.rel (%p1775_p2) target bundleno = 575 (0x23f), region = 28 }
  0x51   : > { %1426 = dma.done.wait (%p1776_p4), [#allocation3], 6144  }
  0x52   : > { %1428 = vsyncadd (%p1776_p4), [#allocation3], 4294961152  ;;  %p1777_p9 = scmp.ne.s32.totalorder %s1767_s19, 0 }
  0x54   : > { %1430 = dma.done.wait (%p1777_p9), [#allocation6], 64  }
  0x55   : > { %1432 = vsyncadd (%p1777_p9), [#allocation6], 4294967232  ;;  %v1465_v0 = vmov 0.0   ;;  %vm1466_vm0 = vmmov 0   ;;  %v1267_v1 = vld [vmem:[#allocation2] sm:$0xff]   ;;  %v1268_v2 = vld [vmem:[#allocation2 + $0x8] sm:$0xff]  }
  0x56   : > { %1068 = vmatprep.subr.bf16.mxu0 %v1465_v0  ;;  %1088 = vmatprep.subr.bf16.mxu1 %v1465_v0  ;;  %v1270_v3 = vld [vmem:[#allocation2 + $0x40] sm:$0xff]   ;;  %v1272_v4 = vld [vmem:[#allocation2 + $0x48] sm:$0xff]   ;;  %v1269_v5 = vld [vmem:[#allocation2 + $0x10] sm:$0xff]   ;;  %p735_p8 = scmp.eq.s32.totalorder %s1451_s12, 1  ;;  %p736_p12 = scmp.eq.s32.totalorder %s1451_s12, 2 }
  0x57   : > { %1084 = vmatprep.mubr.msk.bf16.mxu0 %vm1466_vm0, %v1465_v0  ;;  %1104 = vmatprep.mubr.msk.bf16.mxu1 %vm1466_vm0, %v1465_v0  ;;  %v1274_v6 = vld [vmem:[#allocation2 + $0x50] sm:$0xff]   ;;  %v1271_v7 = vld [vmem:[#allocation2 + $0x18] sm:$0xff]   ;;  %v1273_v9 = vld [vmem:[#allocation2 + $0x20] sm:$0xff]   ;;  %s188_s20 = sand.u32 1, %s1443_s10  }
  0x58   : > { %1069 = vmatpush3.bf16.msra.mxu0 %v1267_v1  ;;  %1089 = vmatpush3.bf16.msra.mxu1 %v1270_v3  ;;  %v1276_v8 = vld [vmem:[#allocation2 + $0x58] sm:$0xff]   ;;  %v1278_v10 = vld [vmem:[#allocation2 + $0x60] sm:$0xff]   ;;  %v1275_v11 = vld [vmem:[#allocation2 + $0x28] sm:$0xff]   ;;  %p1694_p1 = por %p736_p12, %p735_p8  ;;  %s961_s26 = sshll.u32 %s188_s20, 3 }
  0x59   : > { %1070 = vmatprep.subr.bf16.mxu0 %v1465_v0  ;;  %1090 = vmatprep.subr.bf16.mxu1 %v1465_v0  ;;  %v1280_v12 = vld [vmem:[#allocation2 + $0x68] sm:$0xff]   ;;  %v1277_v13 = vld [vmem:[#allocation2 + $0x30] sm:$0xff]   ;;  %v1279_v15 = vld [vmem:[#allocation2 + $0x38] sm:$0xff]   ;;  %s1701_s6 = scalar_lea.vmem [#allocation7], %s961_s26  ;;  %vm1468_vm1 = vmmov (%p1694_p1), 0  }
  0x5a   : > { %v1282_v14 = vld [vmem:[#allocation2 + $0x70] sm:$0xff]   ;;  %v1654_v16 = vld [vmem:[#allocation5] sm:$0xf]  ;;  %v1284_v17 = vld [vmem:[#allocation2 + $0x78] sm:$0xff]  }
  0x5b   : > { %v1281_v18 = vld [vmem:[#allocation2 + $0x80] sm:$0xff]   ;;  %v1283_v20 = vld [vmem:[#allocation2 + $0x88] sm:$0xff]   ;;  %v1285_v22 = vld [vmem:[#allocation2 + $0x90] sm:$0xff]  }
  0x5c   : > { %1071 = vmatpush3.bf16.msra.mxu0 %v1268_v2  ;;  %1091 = vmatpush3.bf16.msra.mxu1 %v1272_v4  ;;  %v1286_v19 = vld [vmem:[#allocation2 + $0xc0] sm:$0xff]   ;;  %v1288_v21 = vld [vmem:[#allocation2 + $0xc8] sm:$0xff]   ;;  %v1290_v23 = vld [vmem:[#allocation2 + $0xd0] sm:$0xff]  }
  0x5d   : > { %1072 = vmatprep.subr.bf16.mxu0 %v1465_v0  ;;  %1092 = vmatprep.subr.bf16.mxu1 %v1465_v0  ;;  %v1287_v24 = vld [vmem:[#allocation2 + $0x98] sm:$0xff]   ;;  %v1289_v26 = vld [vmem:[#allocation2 + $0xa0] sm:$0xff]   ;;  %v1291_v28 = vld [vmem:[#allocation2 + $0xa8] sm:$0xff]  }
  0x5e   : > { %v1292_v25 = vld [vmem:[#allocation2 + $0xd8] sm:$0xff]   ;;  %v1294_v27 = vld [vmem:[#allocation2 + $0xe0] sm:$0xff]   ;;  %v1296_v29 = vld [vmem:[#allocation2 + $0xe8] sm:$0xff]  }
  0x5f   : > { %v1293_v30 = vld [vmem:[#allocation2 + $0xb0] sm:$0xff]   ;;  %v1295_v32 = vld [vmem:[#allocation2 + $0xb8] sm:$0xff]   ;;  %v1297_v34 = vld [vmem:[#allocation2 + $0x100] sm:$0xff]  }
  0x60   : > { %1073 = vmatpush3.bf16.msra.mxu0 %v1269_v5  ;;  %1093 = vmatpush3.bf16.msra.mxu1 %v1274_v6  ;;  %v1298_v31 = vld [vmem:[#allocation2 + $0xf0] sm:$0xff]   ;;  %v1300_v33 = vld [vmem:[#allocation2 + $0xf8] sm:$0xff]   ;;  %v1299_v35 = vld [vmem:[#allocation2 + $0x108] sm:$0xff]  }
  0x61   : > { %1074 = vmatprep.subr.bf16.mxu0 %v1465_v0  ;;  %1094 = vmatprep.subr.bf16.mxu1 %v1465_v0  ;;  %v1301_v36 = vld [vmem:[#allocation2 + $0x110] sm:$0xff]   ;;  %v1302_v37 = vld [vmem:[#allocation2 + $0x118] sm:$0xff]   ;;  %v1303_v38 = vld [vmem:[#allocation2 + $0x120] sm:$0xff]  }
  0x62   : > { %v1304_v39 = vld [vmem:[#allocation2 + $0x128] sm:$0xff]   ;;  %v1305_v40 = vld [vmem:[#allocation2 + $0x130] sm:$0xff]   ;;  %v1306_v41 = vld [vmem:[#allocation2 + $0x138] sm:$0xff]  }
  0x64   : > { %1075 = vmatpush3.bf16.msra.mxu0 %v1271_v7  ;;  %1095 = vmatpush3.bf16.msra.mxu1 %v1276_v8  ;;  %v1307_v7 = vld [vmem:[#allocation2 + $0x140] sm:$0xff] (%p1694_p1)   ;;  %v1467_v8 = vmov (%p1694_p1), 0.0  }
  0x65   : > { %1076 = vmatprep.subr.bf16.mxu0 %v1465_v0  ;;  %1096 = vmatprep.subr.bf16.mxu1 %v1465_v0 }
  0x68   : > { %1077 = vmatpush3.bf16.msra.mxu0 %v1273_v9  ;;  %1097 = vmatpush3.bf16.msra.mxu1 %v1278_v10  ;;  %v1308_v9 = vld [vmem:[#allocation2 + $0x148] sm:$0xff] (%p1694_p1)   ;;  %v1309_v10 = vld [vmem:[#allocation2 + $0x150] sm:$0xff] (%p1694_p1)  }
  0x69   : > { %1078 = vmatprep.subr.bf16.mxu0 %v1465_v0  ;;  %1098 = vmatprep.subr.bf16.mxu1 %v1465_v0 }
  0x6c   : > { %1079 = vmatpush3.bf16.msra.mxu0 %v1275_v11  ;;  %1099 = vmatpush3.bf16.msra.mxu1 %v1280_v12  ;;  %v1310_v11 = vld [vmem:[#allocation2 + $0x158] sm:$0xff] (%p1694_p1)   ;;  %v1311_v12 = vld [vmem:[#allocation2 + $0x160] sm:$0xff] (%p1694_p1)  }
  0x6d   : > { %1080 = vmatprep.subr.bf16.mxu0 %v1465_v0  ;;  %1100 = vmatprep.subr.bf16.mxu1 %v1465_v0 }
  0x70   : > { %1081 = vmatpush3.bf16.msra.mxu0 %v1277_v13  ;;  %1101 = vmatpush3.bf16.msra.mxu1 %v1282_v14  ;;  %v1312_v13 = vld [vmem:[#allocation2 + $0x168] sm:$0xff] (%p1694_p1)   ;;  %v1313_v14 = vld [vmem:[#allocation2 + $0x170] sm:$0xff] (%p1694_p1)  }
  0x71   : > { %1082 = vmatprep.subr.bf16.mxu0 %v1465_v0  ;;  %1102 = vmatprep.subr.bf16.mxu1 %v1465_v0 }
  0x74   : > { %1083 = vmatpush3.bf16.msra.mxu0 %v1279_v15  ;;  %1103 = vmatpush3.bf16.msra.mxu1 %v1284_v17  ;;  %v1314_v15 = vld [vmem:[#allocation2 + $0x178] sm:$0xff] (%p1694_p1)  }
  0x75   : > { %1108 = vmatprep.subr.bf16.mxu0 %v1465_v0  ;;  %1128 = vmatprep.subr.bf16.mxu1 %v1465_v0 }
  0x77   : > { %1085 = vmatmul.mubr.bf16.vlgmr.msra.gmra.mrb[0].mxu0 %v1654_v16  ;;  %1105 = vmatmul.mubr.bf16.vlgmr.msra.gmra.mrb[0].mxu1 %v1654_v16 }
  0x78   : > { %1109 = vmatpush3.bf16.msra.mxu0 %v1281_v18  ;;  %1124 = vmatprep.mubr.msk.bf16.mxu0 %vm1466_vm0, %v1465_v0 }
  0x79   : > { %1110 = vmatprep.subr.bf16.mxu0 %v1465_v0  ;;  %1129 = vmatpush3.bf16.msra.mxu1 %v1286_v19 }
  0x7a   : > { %1144 = vmatprep.mubr.msk.bf16.mxu1 %vm1466_vm0, %v1465_v0  ;;  %1130 = vmatprep.subr.bf16.mxu1 %v1465_v0 }
  0x7c   : > { %1111 = vmatpush3.bf16.msra.mxu0 %v1283_v20 }
  0x7d   : > { %1112 = vmatprep.subr.bf16.mxu0 %v1465_v0  ;;  %1131 = vmatpush3.bf16.msra.mxu1 %v1288_v21 }
  0x7e   : > { %1132 = vmatprep.subr.bf16.mxu1 %v1465_v0 }
  0x80   : > { %1113 = vmatpush3.bf16.msra.mxu0 %v1285_v22 }
  0x81   : > { %1114 = vmatprep.subr.bf16.mxu0 %v1465_v0  ;;  %1133 = vmatpush3.bf16.msra.mxu1 %v1290_v23 }
  0x82   : > { %1134 = vmatprep.subr.bf16.mxu1 %v1465_v0 }
  0x84   : > { %1115 = vmatpush3.bf16.msra.mxu0 %v1287_v24 }
  0x85   : > { %1116 = vmatprep.subr.bf16.mxu0 %v1465_v0  ;;  %1135 = vmatpush3.bf16.msra.mxu1 %v1292_v25 }
  0x86   : > { %1136 = vmatprep.subr.bf16.mxu1 %v1465_v0 }
  0x88   : > { %1117 = vmatpush3.bf16.msra.mxu0 %v1289_v26 }
  0x89   : > { %1118 = vmatprep.subr.bf16.mxu0 %v1465_v0  ;;  %1137 = vmatpush3.bf16.msra.mxu1 %v1294_v27 }
  0x8a   : > { %1138 = vmatprep.subr.bf16.mxu1 %v1465_v0 }
  0x8c   : > { %1119 = vmatpush3.bf16.msra.mxu0 %v1291_v28 }
  0x8d   : > { %1120 = vmatprep.subr.bf16.mxu0 %v1465_v0  ;;  %1139 = vmatpush3.bf16.msra.mxu1 %v1296_v29 }
  0x8e   : > { %1140 = vmatprep.subr.bf16.mxu1 %v1465_v0 }
  0x90   : > { %1121 = vmatpush3.bf16.msra.mxu0 %v1293_v30 }
  0x91   : > { %1122 = vmatprep.subr.bf16.mxu0 %v1465_v0  ;;  %1141 = vmatpush3.bf16.msra.mxu1 %v1298_v31 }
  0x92   : > { %1142 = vmatprep.subr.bf16.mxu1 %v1465_v0 }
  0x94   : > { %1123 = vmatpush3.bf16.msra.mxu0 %v1295_v32 }
  0x95   : > { %1148 = vmatprep.subr.bf16.mxu0 %v1465_v0  ;;  %1143 = vmatpush3.bf16.msra.mxu1 %v1300_v33 }
  0x97   : > { %1125 = vmatmul.mubr.bf16.vlgmr.msra.gmra.mrb[4].mxu0 %v1654_v16 }
  0x98   : > { %1149 = vmatpush3.bf16.msra.mxu0 %v1297_v34  ;;  %1164 = vmatprep.mubr.msk.bf16.mxu0 %vm1466_vm0, %v1465_v0 }
  0x99   : > { %1150 = vmatprep.subr.bf16.mxu0 %v1465_v0  ;;  %1145 = vmatmul.mubr.bf16.vlgmr.msra.gmra.mrb[4].mxu1 %v1654_v16 }
  0x9c   : > { %1151 = vmatpush3.bf16.msra.mxu0 %v1299_v35 }
  0x9d   : > { %1152 = vmatprep.subr.bf16.mxu0 %v1465_v0 }
  0xa0   : > { %1153 = vmatpush3.bf16.msra.mxu0 %v1301_v36 }
  0xa1   : > { %1154 = vmatprep.subr.bf16.mxu0 %v1465_v0 }
  0xa4   : > { %1155 = vmatpush3.bf16.msra.mxu0 %v1302_v37 }
  0xa5   : > { %1156 = vmatprep.subr.bf16.mxu0 %v1465_v0 }
  0xa8   : > { %1157 = vmatpush3.bf16.msra.mxu0 %v1303_v38 }
  0xa9   : > { %1158 = vmatprep.subr.bf16.mxu0 %v1465_v0 }
  0xac   : > { %1159 = vmatpush3.bf16.msra.mxu0 %v1304_v39 }
  0xad   : > { %1160 = vmatprep.subr.bf16.mxu0 %v1465_v0 }
  0xb0   : > { %1161 = vmatpush3.bf16.msra.mxu0 %v1305_v40 }
  0xb1   : > { %1162 = vmatprep.subr.bf16.mxu0 %v1465_v0 }
  0xb4   : > { %1163 = vmatpush3.bf16.msra.mxu0 %v1306_v41 }
  0xb5   : > { %1168 = vmatprep.subr.bf16.mxu0 (%p1694_p1), %v1467_v8 }
  0xb7   : > { %1165 = vmatmul.mubr.bf16.vlgmr.msra.gmra.mrb[8].mxu0 %v1654_v16 }
  0xb8   : > { %1169 = vmatpush3.bf16.msra.mxu0 (%p1694_p1), %v1307_v7  ;;  %1184 = vmatprep.mubr.msk.bf16.mxu0 (%p1694_p1), %vm1468_vm1, %v1467_v8 }
  0xb9   : > { %1170 = vmatprep.subr.bf16.mxu0 (%p1694_p1), %v1467_v8 }
  0xbc   : > { %1171 = vmatpush3.bf16.msra.mxu0 (%p1694_p1), %v1308_v9 }
  0xbd   : > { %1172 = vmatprep.subr.bf16.mxu0 (%p1694_p1), %v1467_v8 }
  0xc0   : > { %1173 = vmatpush3.bf16.msra.mxu0 (%p1694_p1), %v1309_v10 }
  0xc1   : > { %1174 = vmatprep.subr.bf16.mxu0 (%p1694_p1), %v1467_v8 }
  0xc4   : > { %1175 = vmatpush3.bf16.msra.mxu0 (%p1694_p1), %v1310_v11 }
  0xc5   : > { %1176 = vmatprep.subr.bf16.mxu0 (%p1694_p1), %v1467_v8 }
  0xc8   : > { %1177 = vmatpush3.bf16.msra.mxu0 (%p1694_p1), %v1311_v12 }
  0xc9   : > { %1178 = vmatprep.subr.bf16.mxu0 (%p1694_p1), %v1467_v8 }
  0xcc   : > { %1179 = vmatpush3.bf16.msra.mxu0 (%p1694_p1), %v1312_v13 }
  0xcd   : > { %1180 = vmatprep.subr.bf16.mxu0 (%p1694_p1), %v1467_v8 }
  0xd0   : > { %1181 = vmatpush3.bf16.msra.mxu0 (%p1694_p1), %v1313_v14 }
  0xd1   : > { %1182 = vmatprep.subr.bf16.mxu0 (%p1694_p1), %v1467_v8 }
  0xd4   : > { %1183 = vmatpush3.bf16.msra.mxu0 (%p1694_p1), %v1314_v15 }
 0x14a   : > { %v291_v42 = vpop.f32.mrb[0].mxu0  ;;  %v399_v47 = vpop.f32.mrb[0].mxu1 }
 0x14b   : > { %v1086_v43 = vpop.f32.mrb[1].mxu0  ;;  %v297_v44 = vand.u32 2147483647, %v291_v42  ;;  %v405_v48 = vand.u32 2147483647, %v399_v47  ;;  %v1106_v49 = vpop.f32.mrb[1].mxu1 }
 0x14c   : > { %v294_v45 = vpop.f32.mrb[2].mxu0  ;;  %v402_v50 = vpop.f32.mrb[2].mxu1 }
 0x14d   : > { %v1087_v46 = vpop.f32.mrb[3].mxu0  ;;  %v406_v51 = vadd.f32 %v405_v48, %v297_v44  ;;  %v1107_v52 = vpop.f32.mrb[3].mxu1  ;;  %1185 = vmatmul.mubr.bf16.vlgmr.msra.gmra.mrb[0].mxu0 (%p1694_p1), %v1654_v16 }
 0x16a   : > { %v508_v53 = vpop.f32.mrb[4].mxu0 }
 0x16b   : > { %v514_v54 = vand.u32 2147483647, %v508_v53  ;;  %v1126_v55 = vpop.f32.mrb[5].mxu0 }
 0x16c   : > { %v511_v56 = vpop.f32.mrb[6].mxu0  ;;  %v617_v59 = vpop.f32.mrb[4].mxu1 }
 0x16d   : > { %v515_v57 = vadd.f32 %v514_v54, %v406_v51  ;;  %v1127_v58 = vpop.f32.mrb[7].mxu0  ;;  %v623_v60 = vand.u32 2147483647, %v617_v59  ;;  %v1146_v61 = vpop.f32.mrb[5].mxu1 }
 0x16e   : > { %v620_v62 = vpop.f32.mrb[6].mxu1 }
 0x16f   : > { %v624_v63 = vadd.f32 %v623_v60, %v515_v57  ;;  %v1147_v0 = vpop.f32.mrb[7].mxu1 }
 0x189   : > { %740 = sbr.rel (!%p1694_p1) target bundleno = 550 (0x226), region = 40 }
 0x18a   : > { %v726_v1 = vpop.f32.mrb[8].mxu0 }
 0x18b   : > { %v732_v2 = vand.u32 2147483647, %v726_v1  ;;  %v1166_v3 = vpop.f32.mrb[9].mxu0 }
 0x18c   : > { %v729_v4 = vpop.f32.mrb[10].mxu0 }
 0x18d   : > { %v733_v5 = vadd.f32 %v732_v2, %v624_v63  ;;  %v1167_v6 = vpop.f32.mrb[11].mxu0 }
 0x18f   : > { %734 = vst [vmem:[%s1701_s6] sm:$0xff] %v733_v5 }
 0x196   : > { %v741_v17 = vld [vmem:[%s1701_s6] sm:$0xff] }
 0x220   : > { %v841_v18 = vpop.f32.mrb[0].mxu0 }
 0x221   : > { %v847_v19 = vand.u32 2147483647, %v841_v18  ;;  %v1186_v20 = vpop.f32.mrb[1].mxu0 }
 0x222   : > { %v844_v21 = vpop.f32.mrb[2].mxu0 }
 0x223   : > { %v848_v22 = vadd.f32 %v847_v19, %v741_v17  ;;  %v1187_v23 = vpop.f32.mrb[3].mxu0 }
 0x225   : > { %849 = vst [vmem:[%s1701_s6] sm:$0xff] %v848_v22 }
 0x226 PF: > { %s1011_s7 = sshll.u32 %s1451_s12, 7  ;;  %s866_s5 = sshll.u32 %s1701_s6, 4  ;;  %s867_s5 = int_to_ptr.vmem [resolvable:$true] %s866_s5 }
 0x227   : > { %s1713_s30 = scalar_lea.hbm %s1759_s2, %s1011_s7  ;;  %s851_s8 = scalar_lea.sflag [#allocation4], %s188_s20 }
 0x228   : > { %s1373_s15 = scalar_lea.vmem %s867_s5, 128  ;;  %p1779_p0 = scmp.ne.s32.totalorder %s1769_s22, 0 }
 0x229   : > { %p1374_p5 = scmp.ne.s32.totalorder %s867_s5, %s1373_s15  ;;  %s1469_s16 = smov [#allocation7]  }
 0x22a   : > { %s1377_s18 = sshll.u32 %s1469_s16, 4  ;;  %s1378_s18 = int_to_ptr.vmem [resolvable:$false] %s1377_s18 }
 0x22b   : > { %p1375_p7 = pnand %p1374_p5, %p1779_p0  ;;  %s1379_s21 = scalar_lea.vmem %s1378_s18, 256 }
 0x22c   : > { %p1380_p3 = scmp.lt.s32.totalorder %s867_s5, %s1378_s18  ;;  %p1381_p6 = scmp.lt.s32.totalorder %s1379_s21, %s1373_s15 }
 0x22d   : > { %p1376_p13 = pneg %p1375_p7 }
 0x22e   : > { %p1382_p10 = por %p1381_p6, %p1380_p3 }
 0x230   : > { %p1383_p11 = pnand %p1382_p10, %p1376_p13 }
 0x232   : > { %1386 = shalt.err (!%p1383_p11)
}
 0x233   : > { %s1387_s12 = scalar_lea.hbm %s1713_s30, 128  ;;  %s1391_s3 = scalar_lea.hbm %s1759_s2, 384 }
 0x234   : > { %p1388_p2 = scmp.ne.s32.totalorder %s1713_s30, %s1387_s12  ;;  %p1392_p8 = scmp.lt.u32.totalorder %s1713_s30, %s1759_s2 }
 0x235   : > { %p1393_p12 = scmp.lt.u32.totalorder %s1391_s3, %s1387_s12  ;;  %p1395_p5 = scmp.lt.u32.totalorder %s1387_s12, %s1713_s30 }
 0x236   : > { %p1389_p4 = pnand %p1388_p2, %p1779_p0 }
 0x237   : > { %p1394_p1 = por %p1393_p12, %p1392_p8 }
 0x238   : > { %p1390_p9 = pneg %p1389_p4 }
 0x239   : > { %p1396_p7 = por %p1395_p5, %p1394_p1 }
 0x23b   : > { %p1397_p13 = pnand %p1396_p7, %p1390_p9 }
 0x23d   : > { %1400 = shalt.err (!%p1397_p13)
}
 0x23e   : > { %1195 = dma.vmem_to_hbm [thread:$0]  (%p1779_p0), %s867_s5, 128, %s1713_s30, %s851_s8  }
 0x23f PF: > { %p1210_p3 = scmp.ge.s32.totalorder %s1459_s14, 2  ;;  %s878_s20 = sand.u32 1, %s1439_s9  }
 0x240   : > { %p1780_p6 = scmp.ne.s32.totalorder %s1770_s23, 0  ;;  %s879_s26 = scalar_lea.sflag [#allocation4], %s878_s20 }
 0x242   : > { %p1205_p10 = pnand %p1210_p3, %p1780_p6 }
 0x244   : > { %1434 = dma.done.wait (!%p1205_p10), %s879_s26, 128  }
 0x245   : > { %1436 = vsyncadd (!%p1205_p10), %s879_s26, 4294967168  ;;  %s17_s14 = sadd.s32 1, %s1459_s14   ;;  %s1781_s9 = smov %s1443_s10 }
 0x246   : > { %p14_p11 = scmp.ge.s32.totalorder %s17_s14, 5   ;;  %s1782_s10 = smov %s1447_s11 }
 0x247   : > { %s1783_s11 = smov %s1547_s24  ;;  %s1784_s12 = smov %s1455_s13 }
 0x248   : > { %s1785_s13 = smov %s1787_s17  ;;  %16 = sbr.rel (!%p14_p11) target bundleno = 6 (0x6), region = 80 }
 0x24f   :  { %884 = vsyncpa [#allocation3], 1 }
 0x250   :  { %886 = vsyncpa [#allocation3 + $0x1], 1 }
 0x251   :  { %887 = vsyncpa [#allocation6], 1 }
 0x252   :  { %888 = vsyncpa [#allocation4], 1 }
 0x253   :  { %890 = vsyncpa [#allocation4 + $0x1], 1 }

// kernel: tpu_custom_call.1
= control target key start
LH: loop header
LB: loop body
LE: loop exit
PB: predicated region body
PF: predicated region fallthrough
CT: control target
= control target key end

     0   :  { %7 = vsyncpa [#allocation3], 0  ;;  %s1757_s0 = inlined_call_operand.hbm [shape: bf16[3,6,128,128], index: 0, kind: input, shape index: {}]   ;;  %s1758_s1 = inlined_call_operand.hbm [shape: bf16[8,128], index: 1, kind: input, shape index: {}]   ;;  %s1759_s2 = inlined_call_operand.hbm [shape: f32[3,8,128], index: 2, kind: output, shape index: {}]  }
   0x1   :  { %8 = vsyncpa [#allocation6], 0 }
   0x2   :  { %9 = vsyncpa [#allocation4], 0 }
   0x3   :  { %11 = vsyncpa [#allocation4 + $0x1], 0  ;;  %s1485_s9 = smov 0   ;;  %s1487_s10 = smov 0  }
   0x4   :  { %s1489_s11 = smov 0   ;;  %s1491_s12 = smov 0  }
   0x5   :  { %s1493_s13 = smov 0   ;;  %s1495_s14 = smov 0  }
   0x6 LB: > { %s954_s15 = sadd.s32 4294967295, %s1459_s14   ;;  %s955_s16 = sadd.s32 4294967294, %s1459_s14   ;;  %s1459_s14 = sphi %s1495_s14, %s17_s14   ;;  %s1455_s13 = sphi %s1493_s13, %s1785_s13   ;;  %s1451_s12 = sphi %s1491_s12, %s1784_s12   ;;  %s1447_s11 = sphi %s1489_s11, %s1783_s11   ;;  %s1443_s10 = sphi %s1487_s10, %s1782_s10   ;;  %s1439_s9 = sphi %s1485_s9, %s1781_s9  }
   0x7   : > { %s36_s17 = sadd.s32 1, %s1455_s13  ;;  %s45_s18 = sadd.s32 1, %s1447_s11 }
   0x8   : > { %p38_p0 = scmp.ge.s32.totalorder %s36_s17, 3  ;;  %p58_p1 = scmp.ne.s32.totalorder %s1443_s10, %s1439_s9 }
   0x9   : > { %p1521_p2 = scmp.eq.s32.totalorder %s954_s15, 0  ;;  %p111_p3 = scmp.ne.s32.totalorder %s1447_s11, %s1443_s10 }
   0xa   : > { %s1787_s17 = smov (%p38_p0, %s36_s17), 0  ;;  %p112_p5 = scmp.eq.s32.totalorder %s954_s15, 2 }
   0xb   : > { %s1767_s19 = scalar_select %p1521_p2, 1, 0 }
   0xc   : > { %p1531_p4 = por %p1521_p2, %p58_p1  ;;  %s40_s21 = ssub.s32 %s1455_s13, %s1787_s17 }
   0xd   : > { %p118_p6 = scmp.eq.s32.totalorder %s955_s16, 2  ;;  %p43_p7 = scmp.eq.s32.totalorder %s40_s21, 0 }
   0xe   : > { %s1768_s20 = scalar_select %p1531_p4, 1, 0 }
   0xf   : > { %p1537_p8 = por %p112_p5, %p111_p3  ;;  %p1541_p9 = por %p118_p6, %p58_p1 }
  0x10   : > { %p956_p10 = scmp.ge.s32.totalorder %s1459_s14, 1  ;;  %p125_p11 = scmp.lt.s32.totalorder %s1459_s14, 4 }
  0x11   : > { %s1769_s22 = scalar_select %p1537_p8, 1, 0 }
  0x12   : > { %s1770_s23 = scalar_select %p1541_p9, 1, 0 }
  0x13   : > { %s1547_s24 = scalar_select %p43_p7, %s1447_s11, %s45_s18  }
  0x14   : > { %s1188_s25 = smul.u32 6144, %s1451_s12  ;;  %p1551_p12 = pnand %p956_p10, %p125_p11 }
  0x15   : > { %s1461_s30 = smov [#allocation2]   ;;  %s1462_s5 = smov [#allocation5]  }
  0x16   : > { %s1771_s26 = scalar_select %p1551_p12, 1, 0 }
  0x17   : > { %s1558_s29 = scalar_lea.hbm %s1757_s0, %s1188_s25  ;;  %s141_s3 = sshll.u32 %s1461_s30, 4  ;;  %s1562_s3 = int_to_ptr.vmem [resolvable:$true] %s141_s3 }
  0x18   : > { %p1197_p13 = pneg %p1551_p12  ;;  %s157_s6 = sshll.u32 %s1462_s5, 4  ;;  %s1576_s6 = int_to_ptr.vmem [resolvable:$true] %s157_s6 }
  0x19   : > { %s1315_s8 = scalar_lea.hbm %s1558_s29, 6144  ;;  %s1320_s18 = scalar_lea.hbm %s1757_s0, 18432 }
  0x1a   : > { %p1566_p0 = pnand %p1197_p13, %p1531_p4  ;;  %p1572_p1 = pnand %p1197_p13, %p1521_p2 }
  0x1b   : > { %p1316_p3 = scmp.ne.s32.totalorder %s1558_s29, %s1315_s8  ;;  %p1321_p10 = scmp.lt.u32.totalorder %s1558_s29, %s1757_s0 }
  0x1c   : > { %s1773_s7 = scalar_select %p1572_p1, 1, 0 }
  0x1d   : > { %p1317_p5 = pneg %p1566_p0  ;;  %p1322_p11 = scmp.lt.u32.totalorder %s1320_s18, %s1315_s8 }
  0x1e   : > { %p1324_p9 = scmp.lt.u32.totalorder %s1315_s8, %s1558_s29 }
  0x1f   : > { %p1318_p6 = pnand %p1317_p5, %p1316_p3  ;;  %p1323_p13 = por %p1322_p11, %p1321_p10 }
  0x21   : > { %p1319_p7 = pneg %p1318_p6  ;;  %p1325_p8 = por %p1324_p9, %p1323_p13 }
  0x23   : > { %p1326_p2 = pnand %p1325_p8, %p1319_p7 }
  0x25   : > { %1329 = shalt.err (!%p1326_p2)
}
  0x26   : > { %s1330_s27 = scalar_lea.vmem %s1562_s3, 6144  ;;  %p1338_p12 = scmp.lt.s32.totalorder %s1562_s3, %s1562_s3 }
  0x27   : > { %p1331_p3 = scmp.ne.s32.totalorder %s1562_s3, %s1330_s27  ;;  %p1339_p1 = scmp.lt.s32.totalorder %s1330_s27, %s1330_s27 }
  0x29   : > { %p1333_p6 = pnand %p1331_p3, %p1317_p5  ;;  %p1340_p10 = por %p1339_p1, %p1338_p12 }
  0x2b   : > { %p1334_p4 = pneg %p1333_p6 }
  0x2d   : > { %p1341_p11 = pnand %p1340_p10, %p1334_p4 }
  0x2f   : > { %1344 = shalt.err (!%p1341_p11)
}
  0x30   : > { %s1463_s28 = smov 64   ;;  %s1464_s30 = smov 4  }
  0x31   : > { %1200 = dma.hbm_to_vmem [thread:$0]  (!%p1566_p0), %s1558_s29, 6144, %s1562_s3, [#allocation3], %s1463_s28, %s1463_s28, %s1464_s30  }
  0x32   : > { %s1345_s15 = scalar_lea.hbm %s1758_s1, 64  ;;  %p1774_p8 = scmp.ne.s32.totalorder %s1773_s7, 0 }
  0x33   : > { %p1346_p2 = scmp.ne.s32.totalorder %s1758_s1, %s1345_s15  ;;  %p1352_p1 = scmp.lt.u32.totalorder %s1345_s15, %s1758_s1 }
  0x34   : > { %p1347_p9 = pneg %p1774_p8 }
  0x36   : > { %p1348_p4 = pnand %p1347_p9, %p1346_p2 }
  0x38   : > { %p1349_p12 = pneg %p1348_p4 }
  0x3a   : > { %p1354_p5 = pnand %p1352_p1, %p1349_p12 }
  0x3c   : > { %1357 = shalt.err (!%p1354_p5)
}
  0x3d   : > { %s1358_s29 = scalar_lea.vmem %s1576_s6, 64  ;;  %p1366_p3 = scmp.lt.s32.totalorder %s1576_s6, %s1576_s6 }
  0x3e   : > { %p1359_p0 = scmp.ne.s32.totalorder %s1576_s6, %s1358_s29  ;;  %p1367_p6 = scmp.lt.s32.totalorder %s1358_s29, %s1358_s29 }
  0x40   : > { %p1361_p7 = pnand %p1359_p0, %p1347_p9  ;;  %p1368_p10 = por %p1367_p6, %p1366_p3 }
  0x42   : > { %p1362_p13 = pneg %p1361_p7 }
  0x44   : > { %p1369_p11 = pnand %p1368_p10, %p1362_p13 }
  0x46   : > { %1372 = shalt.err (!%p1369_p11)
}
  0x47   : > { %1203 = dma.hbm_to_vmem [thread:$0]  (!%p1774_p8), %s1758_s1, 64, %s1576_s6, [#allocation6]  }
  0x48   : > { %p1775_p2 = scmp.ne.s32.totalorder %s1771_s26, 0 }
  0x49   : > { %p1776_p4 = scmp.ne.s32.totalorder (!%p1775_p2), %s1768_s20, 0 }
  0x4a   : > { %170 = sbr.rel (%p1775_p2) target bundleno = 575 (0x23f), region = 28 }
  0x51   : > { %1426 = dma.done.wait (%p1776_p4), [#allocation3], 6144  }
  0x52   : > { %1428 = vsyncadd (%p1776_p4), [#allocation3], 4294961152  ;;  %p1777_p9 = scmp.ne.s32.totalorder %s1767_s19, 0 }
  0x54   : > { %1430 = dma.done.wait (%p1777_p9), [#allocation6], 64  }
  0x55   : > { %1432 = vsyncadd (%p1777_p9), [#allocation6], 4294967232  ;;  %v1465_v0 = vmov 0.0   ;;  %vm1466_vm0 = vmmov 0   ;;  %v1267_v1 = vld [vmem:[#allocation2] sm:$0xff]   ;;  %v1268_v2 = vld [vmem:[#allocation2 + $0x8] sm:$0xff]  }
  0x56   : > { %1068 = vmatprep.subr.bf16.mxu0 %v1465_v0  ;;  %1088 = vmatprep.subr.bf16.mxu1 %v1465_v0  ;;  %v1270_v3 = vld [vmem:[#allocation2 + $0x40] sm:$0xff]   ;;  %v1272_v4 = vld [vmem:[#allocation2 + $0x48] sm:$0xff]   ;;  %v1269_v5 = vld [vmem:[#allocation2 + $0x10] sm:$0xff]   ;;  %p735_p8 = scmp.eq.s32.totalorder %s1451_s12, 1  ;;  %p736_p12 = scmp.eq.s32.totalorder %s1451_s12, 2 }
  0x57   : > { %1084 = vmatprep.mubr.msk.bf16.mxu0 %vm1466_vm0, %v1465_v0  ;;  %1104 = vmatprep.mubr.msk.bf16.mxu1 %vm1466_vm0, %v1465_v0  ;;  %v1274_v6 = vld [vmem:[#allocation2 + $0x50] sm:$0xff]   ;;  %v1271_v7 = vld [vmem:[#allocation2 + $0x18] sm:$0xff]   ;;  %v1273_v9 = vld [vmem:[#allocation2 + $0x20] sm:$0xff]   ;;  %s188_s20 = sand.u32 1, %s1443_s10  }
  0x58   : > { %1069 = vmatpush3.bf16.msra.mxu0 %v1267_v1  ;;  %1089 = vmatpush3.bf16.msra.mxu1 %v1270_v3  ;;  %v1276_v8 = vld [vmem:[#allocation2 + $0x58] sm:$0xff]   ;;  %v1278_v10 = vld [vmem:[#allocation2 + $0x60] sm:$0xff]   ;;  %v1275_v11 = vld [vmem:[#allocation2 + $0x28] sm:$0xff]   ;;  %p1694_p1 = por %p736_p12, %p735_p8  ;;  %s961_s26 = sshll.u32 %s188_s20, 3 }
  0x59   : > { %1070 = vmatprep.subr.bf16.mxu0 %v1465_v0  ;;  %1090 = vmatprep.subr.bf16.mxu1 %v1465_v0  ;;  %v1280_v12 = vld [vmem:[#allocation2 + $0x68] sm:$0xff]   ;;  %v1277_v13 = vld [vmem:[#allocation2 + $0x30] sm:$0xff]   ;;  %v1279_v15 = vld [vmem:[#allocation2 + $0x38] sm:$0xff]   ;;  %s1701_s6 = scalar_lea.vmem [#allocation7], %s961_s26  ;;  %vm1468_vm1 = vmmov (%p1694_p1), 0  }
  0x5a   : > { %v1282_v14 = vld [vmem:[#allocation2 + $0x70] sm:$0xff]   ;;  %v1654_v16 = vld [vmem:[#allocation5] sm:$0xf]  ;;  %v1284_v17 = vld [vmem:[#allocation2 + $0x78] sm:$0xff]  }
  0x5b   : > { %v1281_v18 = vld [vmem:[#allocation2 + $0x80] sm:$0xff]   ;;  %v1283_v20 = vld [vmem:[#allocation2 + $0x88] sm:$0xff]   ;;  %v1285_v22 = vld [vmem:[#allocation2 + $0x90] sm:$0xff]  }
  0x5c   : > { %1071 = vmatpush3.bf16.msra.mxu0 %v1268_v2  ;;  %1091 = vmatpush3.bf16.msra.mxu1 %v1272_v4  ;;  %v1286_v19 = vld [vmem:[#allocation2 + $0xc0] sm:$0xff]   ;;  %v1288_v21 = vld [vmem:[#allocation2 + $0xc8] sm:$0xff]   ;;  %v1290_v23 = vld [vmem:[#allocation2 + $0xd0] sm:$0xff]  }
  0x5d   : > { %1072 = vmatprep.subr.bf16.mxu0 %v1465_v0  ;;  %1092 = vmatprep.subr.bf16.mxu1 %v1465_v0  ;;  %v1287_v24 = vld [vmem:[#allocation2 + $0x98] sm:$0xff]   ;;  %v1289_v26 = vld [vmem:[#allocation2 + $0xa0] sm:$0xff]   ;;  %v1291_v28 = vld [vmem:[#allocation2 + $0xa8] sm:$0xff]  }
  0x5e   : > { %v1292_v25 = vld [vmem:[#allocation2 + $0xd8] sm:$0xff]   ;;  %v1294_v27 = vld [vmem:[#allocation2 + $0xe0] sm:$0xff]   ;;  %v1296_v29 = vld [vmem:[#allocation2 + $0xe8] sm:$0xff]  }
  0x5f   : > { %v1293_v30 = vld [vmem:[#allocation2 + $0xb0] sm:$0xff]   ;;  %v1295_v32 = vld [vmem:[#allocation2 + $0xb8] sm:$0xff]   ;;  %v1297_v34 = vld [vmem:[#allocation2 + $0x100] sm:$0xff]  }
  0x60   : > { %1073 = vmatpush3.bf16.msra.mxu0 %v1269_v5  ;;  %1093 = vmatpush3.bf16.msra.mxu1 %v1274_v6  ;;  %v1298_v31 = vld [vmem:[#allocation2 + $0xf0] sm:$0xff]   ;;  %v1300_v33 = vld [vmem:[#allocation2 + $0xf8] sm:$0xff]   ;;  %v1299_v35 = vld [vmem:[#allocation2 + $0x108] sm:$0xff]  }
  0x61   : > { %1074 = vmatprep.subr.bf16.mxu0 %v1465_v0  ;;  %1094 = vmatprep.subr.bf16.mxu1 %v1465_v0  ;;  %v1301_v36 = vld [vmem:[#allocation2 + $0x110] sm:$0xff]   ;;  %v1302_v37 = vld [vmem:[#allocation2 + $0x118] sm:$0xff]   ;;  %v1303_v38 = vld [vmem:[#allocation2 + $0x120] sm:$0xff]  }
  0x62   : > { %v1304_v39 = vld [vmem:[#allocation2 + $0x128] sm:$0xff]   ;;  %v1305_v40 = vld [vmem:[#allocation2 + $0x130] sm:$0xff]   ;;  %v1306_v41 = vld [vmem:[#allocation2 + $0x138] sm:$0xff]  }
  0x64   : > { %1075 = vmatpush3.bf16.msra.mxu0 %v1271_v7  ;;  %1095 = vmatpush3.bf16.msra.mxu1 %v1276_v8  ;;  %v1307_v7 = vld [vmem:[#allocation2 + $0x140] sm:$0xff] (%p1694_p1)   ;;  %v1467_v8 = vmov (%p1694_p1), 0.0  }
  0x65   : > { %1076 = vmatprep.subr.bf16.mxu0 %v1465_v0  ;;  %1096 = vmatprep.subr.bf16.mxu1 %v1465_v0 }
  0x68   : > { %1077 = vmatpush3.bf16.msra.mxu0 %v1273_v9  ;;  %1097 = vmatpush3.bf16.msra.mxu1 %v1278_v10  ;;  %v1308_v9 = vld [vmem:[#allocation2 + $0x148] sm:$0xff] (%p1694_p1)   ;;  %v1309_v10 = vld [vmem:[#allocation2 + $0x150] sm:$0xff] (%p1694_p1)  }
  0x69   : > { %1078 = vmatprep.subr.bf16.mxu0 %v1465_v0  ;;  %1098 = vmatprep.subr.bf16.mxu1 %v1465_v0 }
  0x6c   : > { %1079 = vmatpush3.bf16.msra.mxu0 %v1275_v11  ;;  %1099 = vmatpush3.bf16.msra.mxu1 %v1280_v12  ;;  %v1310_v11 = vld [vmem:[#allocation2 + $0x158] sm:$0xff] (%p1694_p1)   ;;  %v1311_v12 = vld [vmem:[#allocation2 + $0x160] sm:$0xff] (%p1694_p1)  }
  0x6d   : > { %1080 = vmatprep.subr.bf16.mxu0 %v1465_v0  ;;  %1100 = vmatprep.subr.bf16.mxu1 %v1465_v0 }
  0x70   : > { %1081 = vmatpush3.bf16.msra.mxu0 %v1277_v13  ;;  %1101 = vmatpush3.bf16.msra.mxu1 %v1282_v14  ;;  %v1312_v13 = vld [vmem:[#allocation2 + $0x168] sm:$0xff] (%p1694_p1)   ;;  %v1313_v14 = vld [vmem:[#allocation2 + $0x170] sm:$0xff] (%p1694_p1)  }
  0x71   : > { %1082 = vmatprep.subr.bf16.mxu0 %v1465_v0  ;;  %1102 = vmatprep.subr.bf16.mxu1 %v1465_v0 }
  0x74   : > { %1083 = vmatpush3.bf16.msra.mxu0 %v1279_v15  ;;  %1103 = vmatpush3.bf16.msra.mxu1 %v1284_v17  ;;  %v1314_v15 = vld [vmem:[#allocation2 + $0x178] sm:$0xff] (%p1694_p1)  }
  0x75   : > { %1108 = vmatprep.subr.bf16.mxu0 %v1465_v0  ;;  %1128 = vmatprep.subr.bf16.mxu1 %v1465_v0 }
  0x77   : > { %1085 = vmatmul.mubr.bf16.vlgmr.msra.gmra.mrb[0].mxu0 %v1654_v16  ;;  %1105 = vmatmul.mubr.bf16.vlgmr.msra.gmra.mrb[0].mxu1 %v1654_v16 }
  0x78   : > { %1109 = vmatpush3.bf16.msra.mxu0 %v1281_v18  ;;  %1124 = vmatprep.mubr.msk.bf16.mxu0 %vm1466_vm0, %v1465_v0 }
  0x79   : > { %1110 = vmatprep.subr.bf16.mxu0 %v1465_v0  ;;  %1129 = vmatpush3.bf16.msra.mxu1 %v1286_v19 }
  0x7a   : > { %1144 = vmatprep.mubr.msk.bf16.mxu1 %vm1466_vm0, %v1465_v0  ;;  %1130 = vmatprep.subr.bf16.mxu1 %v1465_v0 }
  0x7c   : > { %1111 = vmatpush3.bf16.msra.mxu0 %v1283_v20 }
  0x7d   : > { %1112 = vmatprep.subr.bf16.mxu0 %v1465_v0  ;;  %1131 = vmatpush3.bf16.msra.mxu1 %v1288_v21 }
  0x7e   : > { %1132 = vmatprep.subr.bf16.mxu1 %v1465_v0 }
  0x80   : > { %1113 = vmatpush3.bf16.msra.mxu0 %v1285_v22 }
  0x81   : > { %1114 = vmatprep.subr.bf16.mxu0 %v1465_v0  ;;  %1133 = vmatpush3.bf16.msra.mxu1 %v1290_v23 }
  0x82   : > { %1134 = vmatprep.subr.bf16.mxu1 %v1465_v0 }
  0x84   : > { %1115 = vmatpush3.bf16.msra.mxu0 %v1287_v24 }
  0x85   : > { %1116 = vmatprep.subr.bf16.mxu0 %v1465_v0  ;;  %1135 = vmatpush3.bf16.msra.mxu1 %v1292_v25 }
  0x86   : > { %1136 = vmatprep.subr.bf16.mxu1 %v1465_v0 }
  0x88   : > { %1117 = vmatpush3.bf16.msra.mxu0 %v1289_v26 }
  0x89   : > { %1118 = vmatprep.subr.bf16.mxu0 %v1465_v0  ;;  %1137 = vmatpush3.bf16.msra.mxu1 %v1294_v27 }
  0x8a   : > { %1138 = vmatprep.subr.bf16.mxu1 %v1465_v0 }
  0x8c   : > { %1119 = vmatpush3.bf16.msra.mxu0 %v1291_v28 }
  0x8d   : > { %1120 = vmatprep.subr.bf16.mxu0 %v1465_v0  ;;  %1139 = vmatpush3.bf16.msra.mxu1 %v1296_v29 }
  0x8e   : > { %1140 = vmatprep.subr.bf16.mxu1 %v1465_v0 }
  0x90   : > { %1121 = vmatpush3.bf16.msra.mxu0 %v1293_v30 }
  0x91   : > { %1122 = vmatprep.subr.bf16.mxu0 %v1465_v0  ;;  %1141 = vmatpush3.bf16.msra.mxu1 %v1298_v31 }
  0x92   : > { %1142 = vmatprep.subr.bf16.mxu1 %v1465_v0 }
  0x94   : > { %1123 = vmatpush3.bf16.msra.mxu0 %v1295_v32 }
  0x95   : > { %1148 = vmatprep.subr.bf16.mxu0 %v1465_v0  ;;  %1143 = vmatpush3.bf16.msra.mxu1 %v1300_v33 }
  0x97   : > { %1125 = vmatmul.mubr.bf16.vlgmr.msra.gmra.mrb[4].mxu0 %v1654_v16 }
  0x98   : > { %1149 = vmatpush3.bf16.msra.mxu0 %v1297_v34  ;;  %1164 = vmatprep.mubr.msk.bf16.mxu0 %vm1466_vm0, %v1465_v0 }
  0x99   : > { %1150 = vmatprep.subr.bf16.mxu0 %v1465_v0  ;;  %1145 = vmatmul.mubr.bf16.vlgmr.msra.gmra.mrb[4].mxu1 %v1654_v16 }
  0x9c   : > { %1151 = vmatpush3.bf16.msra.mxu0 %v1299_v35 }
  0x9d   : > { %1152 = vmatprep.subr.bf16.mxu0 %v1465_v0 }
  0xa0   : > { %1153 = vmatpush3.bf16.msra.mxu0 %v1301_v36 }
  0xa1   : > { %1154 = vmatprep.subr.bf16.mxu0 %v1465_v0 }
  0xa4   : > { %1155 = vmatpush3.bf16.msra.mxu0 %v1302_v37 }
  0xa5   : > { %1156 = vmatprep.subr.bf16.mxu0 %v1465_v0 }
  0xa8   : > { %1157 = vmatpush3.bf16.msra.mxu0 %v1303_v38 }
  0xa9   : > { %1158 = vmatprep.subr.bf16.mxu0 %v1465_v0 }
  0xac   : > { %1159 = vmatpush3.bf16.msra.mxu0 %v1304_v39 }
  0xad   : > { %1160 = vmatprep.subr.bf16.mxu0 %v1465_v0 }
  0xb0   : > { %1161 = vmatpush3.bf16.msra.mxu0 %v1305_v40 }
  0xb1   : > { %1162 = vmatprep.subr.bf16.mxu0 %v1465_v0 }
  0xb4   : > { %1163 = vmatpush3.bf16.msra.mxu0 %v1306_v41 }
  0xb5   : > { %1168 = vmatprep.subr.bf16.mxu0 (%p1694_p1), %v1467_v8 }
  0xb7   : > { %1165 = vmatmul.mubr.bf16.vlgmr.msra.gmra.mrb[8].mxu0 %v1654_v16 }
  0xb8   : > { %1169 = vmatpush3.bf16.msra.mxu0 (%p1694_p1), %v1307_v7  ;;  %1184 = vmatprep.mubr.msk.bf16.mxu0 (%p1694_p1), %vm1468_vm1, %v1467_v8 }
  0xb9   : > { %1170 = vmatprep.subr.bf16.mxu0 (%p1694_p1), %v1467_v8 }
  0xbc   : > { %1171 = vmatpush3.bf16.msra.mxu0 (%p1694_p1), %v1308_v9 }
  0xbd   : > { %1172 = vmatprep.subr.bf16.mxu0 (%p1694_p1), %v1467_v8 }
  0xc0   : > { %1173 = vmatpush3.bf16.msra.mxu0 (%p1694_p1), %v1309_v10 }
  0xc1   : > { %1174 = vmatprep.subr.bf16.mxu0 (%p1694_p1), %v1467_v8 }
  0xc4   : > { %1175 = vmatpush3.bf16.msra.mxu0 (%p1694_p1), %v1310_v11 }
  0xc5   : > { %1176 = vmatprep.subr.bf16.mxu0 (%p1694_p1), %v1467_v8 }
  0xc8   : > { %1177 = vmatpush3.bf16.msra.mxu0 (%p1694_p1), %v1311_v12 }
  0xc9   : > { %1178 = vmatprep.subr.bf16.mxu0 (%p1694_p1), %v1467_v8 }
  0xcc   : > { %1179 = vmatpush3.bf16.msra.mxu0 (%p1694_p1), %v1312_v13 }
  0xcd   : > { %1180 = vmatprep.subr.bf16.mxu0 (%p1694_p1), %v1467_v8 }
  0xd0   : > { %1181 = vmatpush3.bf16.msra.mxu0 (%p1694_p1), %v1313_v14 }
  0xd1   : > { %1182 = vmatprep.subr.bf16.mxu0 (%p1694_p1), %v1467_v8 }
  0xd4   : > { %1183 = vmatpush3.bf16.msra.mxu0 (%p1694_p1), %v1314_v15 }
 0x14a   : > { %v291_v42 = vpop.f32.mrb[0].mxu0  ;;  %v399_v47 = vpop.f32.mrb[0].mxu1 }
 0x14b   : > { %v1086_v43 = vpop.f32.mrb[1].mxu0  ;;  %v297_v44 = vand.u32 2147483647, %v291_v42  ;;  %v405_v48 = vand.u32 2147483647, %v399_v47  ;;  %v1106_v49 = vpop.f32.mrb[1].mxu1 }
 0x14c   : > { %v294_v45 = vpop.f32.mrb[2].mxu0  ;;  %v402_v50 = vpop.f32.mrb[2].mxu1 }
 0x14d   : > { %v1087_v46 = vpop.f32.mrb[3].mxu0  ;;  %v406_v51 = vadd.f32 %v405_v48, %v297_v44  ;;  %v1107_v52 = vpop.f32.mrb[3].mxu1  ;;  %1185 = vmatmul.mubr.bf16.vlgmr.msra.gmra.mrb[0].mxu0 (%p1694_p1), %v1654_v16 }
 0x16a   : > { %v508_v53 = vpop.f32.mrb[4].mxu0 }
 0x16b   : > { %v514_v54 = vand.u32 2147483647, %v508_v53  ;;  %v1126_v55 = vpop.f32.mrb[5].mxu0 }
 0x16c   : > { %v511_v56 = vpop.f32.mrb[6].mxu0  ;;  %v617_v59 = vpop.f32.mrb[4].mxu1 }
 0x16d   : > { %v515_v57 = vadd.f32 %v514_v54, %v406_v51  ;;  %v1127_v58 = vpop.f32.mrb[7].mxu0  ;;  %v623_v60 = vand.u32 2147483647, %v617_v59  ;;  %v1146_v61 = vpop.f32.mrb[5].mxu1 }
 0x16e   : > { %v620_v62 = vpop.f32.mrb[6].mxu1 }
 0x16f   : > { %v624_v63 = vadd.f32 %v623_v60, %v515_v57  ;;  %v1147_v0 = vpop.f32.mrb[7].mxu1 }
 0x189   : > { %740 = sbr.rel (!%p1694_p1) target bundleno = 550 (0x226), region = 40 }
 0x18a   : > { %v726_v1 = vpop.f32.mrb[8].mxu0 }
 0x18b   : > { %v732_v2 = vand.u32 2147483647, %v726_v1  ;;  %v1166_v3 = vpop.f32.mrb[9].mxu0 }
 0x18c   : > { %v729_v4 = vpop.f32.mrb[10].mxu0 }
 0x18d   : > { %v733_v5 = vadd.f32 %v732_v2, %v624_v63  ;;  %v1167_v6 = vpop.f32.mrb[11].mxu0 }
 0x18f   : > { %734 = vst [vmem:[%s1701_s6] sm:$0xff] %v733_v5 }
 0x196   : > { %v741_v17 = vld [vmem:[%s1701_s6] sm:$0xff] }
 0x220   : > { %v841_v18 = vpop.f32.mrb[0].mxu0 }
 0x221   : > { %v847_v19 = vand.u32 2147483647, %v841_v18  ;;  %v1186_v20 = vpop.f32.mrb[1].mxu0 }
 0x222   : > { %v844_v21 = vpop.f32.mrb[2].mxu0 }
 0x223   : > { %v848_v22 = vadd.f32 %v847_v19, %v741_v17  ;;  %v1187_v23 = vpop.f32.mrb[3].mxu0 }
 0x225   : > { %849 = vst [vmem:[%s1701_s6] sm:$0xff] %v848_v22 }
 0x226 PF: > { %s1011_s7 = sshll.u32 %s1451_s12, 7  ;;  %s866_s5 = sshll.u32 %s1701_s6, 4  ;;  %s867_s5 = int_to_ptr.vmem [resolvable:$true] %s866_s5 }
 0x227   : > { %s1713_s30 = scalar_lea.hbm %s1759_s2, %s1011_s7  ;;  %s851_s8 = scalar_lea.sflag [#allocation4], %s188_s20 }
 0x228   : > { %s1373_s15 = scalar_lea.vmem %s867_s5, 128  ;;  %p1779_p0 = scmp.ne.s32.totalorder %s1769_s22, 0 }
 0x229   : > { %p1374_p5 = scmp.ne.s32.totalorder %s867_s5, %s1373_s15  ;;  %s1469_s16 = smov [#allocation7]  }
 0x22a   : > { %s1377_s18 = sshll.u32 %s1469_s16, 4  ;;  %s1378_s18 = int_to_ptr.vmem [resolvable:$false] %s1377_s18 }
 0x22b   : > { %p1375_p7 = pnand %p1374_p5, %p1779_p0  ;;  %s1379_s21 = scalar_lea.vmem %s1378_s18, 256 }
 0x22c   : > { %p1380_p3 = scmp.lt.s32.totalorder %s867_s5, %s1378_s18  ;;  %p1381_p6 = scmp.lt.s32.totalorder %s1379_s21, %s1373_s15 }
 0x22d   : > { %p1376_p13 = pneg %p1375_p7 }
 0x22e   : > { %p1382_p10 = por %p1381_p6, %p1380_p3 }
 0x230   : > { %p1383_p11 = pnand %p1382_p10, %p1376_p13 }
 0x232   : > { %1386 = shalt.err (!%p1383_p11)
}
 0x233   : > { %s1387_s12 = scalar_lea.hbm %s1713_s30, 128  ;;  %s1391_s3 = scalar_lea.hbm %s1759_s2, 384 }
 0x234   : > { %p1388_p2 = scmp.ne.s32.totalorder %s1713_s30, %s1387_s12  ;;  %p1392_p8 = scmp.lt.u32.totalorder %s1713_s30, %s1759_s2 }
 0x235   : > { %p1393_p12 = scmp.lt.u32.totalorder %s1391_s3, %s1387_s12  ;;  %p1395_p5 = scmp.lt.u32.totalorder %s1387_s12, %s1713_s30 }
 0x236   : > { %p1389_p4 = pnand %p1388_p2, %p1779_p0 }
 0x237   : > { %p1394_p1 = por %p1393_p12, %p1392_p8 }
 0x238   : > { %p1390_p9 = pneg %p1389_p4 }
 0x239   : > { %p1396_p7 = por %p1395_p5, %p1394_p1 }
 0x23b   : > { %p1397_p13 = pnand %p1396_p7, %p1390_p9 }
 0x23d   : > { %1400 = shalt.err (!%p1397_p13)
}
 0x23e   : > { %1195 = dma.vmem_to_hbm [thread:$0]  (%p1779_p0), %s867_s5, 128, %s1713_s30, %s851_s8  }
 0x23f PF: > { %p1210_p3 = scmp.ge.s32.totalorder %s1459_s14, 2  ;;  %s878_s20 = sand.u32 1, %s1439_s9  }
 0x240   : > { %p1780_p6 = scmp.ne.s32.totalorder %s1770_s23, 0  ;;  %s879_s26 = scalar_lea.sflag [#allocation4], %s878_s20 }
 0x242   : > { %p1205_p10 = pnand %p1210_p3, %p1780_p6 }
 0x244   : > { %1434 = dma.done.wait (!%p1205_p10), %s879_s26, 128  }
 0x245   : > { %1436 = vsyncadd (!%p1205_p10), %s879_s26, 4294967168  ;;  %s17_s14 = sadd.s32 1, %s1459_s14   ;;  %s1781_s9 = smov %s1443_s10 }
 0x246   : > { %p14_p11 = scmp.ge.s32.totalorder %s17_s14, 5   ;;  %s1782_s10 = smov %s1447_s11 }
 0x247   : > { %s1783_s11 = smov %s1547_s24  ;;  %s1784_s12 = smov %s1455_s13 }
 0x248   : > { %s1785_s13 = smov %s1787_s17  ;;  %16 = sbr.rel (!%p14_p11) target bundleno = 6 (0x6), region = 80 }
 0x24f   :  { %884 = vsyncpa [#allocation3], 1 }
 0x250   :  { %886 = vsyncpa [#allocation3 + $0x1], 1 }
 0x251   :  { %887 = vsyncpa [#allocation6], 1 }
 0x252   :  { %888 = vsyncpa [#allocation4], 1 }
 0x253   :  { %890 = vsyncpa [#allocation4 + $0x1], 1 }

// kernel: tpu_custom_call.1
= control target key start
LH: loop header
LB: loop body
LE: loop exit
PB: predicated region body
PF: predicated region fallthrough
CT: control target
= control target key end

     0   :  { %7 = vsyncpa [#allocation3], 0  ;;  %s1929_s0 = inlined_call_operand.hbm [shape: bf16[3,6,128,128], index: 0, kind: input, shape index: {}]   ;;  %s1930_s1 = inlined_call_operand.hbm [shape: bf16[8,128], index: 1, kind: input, shape index: {}]   ;;  %s1931_s2 = inlined_call_operand.hbm [shape: f32[3,8,128], index: 2, kind: output, shape index: {}]  }
   0x1   :  { %9 = vsyncpa [#allocation3 + $0x1], 0 }
   0x2   :  { %10 = vsyncpa [#allocation6], 0 }
   0x3   :  { %11 = vsyncpa [#allocation4], 0 }
   0x4   :  { %13 = vsyncpa [#allocation4 + $0x1], 0  ;;  %s1595_s9 = smov 0   ;;  %s1597_s10 = smov 0  }
   0x5   :  { %s1599_s11 = smov 0   ;;  %s1601_s12 = smov 0  }
   0x6   :  { %s1603_s13 = smov 0   ;;  %s1605_s14 = smov 0  }
   0x7 LB: > { %s980_s15 = sadd.s32 4294967295, %s1569_s14   ;;  %s981_s16 = sadd.s32 4294967294, %s1569_s14   ;;  %s1569_s14 = sphi %s1605_s14, %s19_s14   ;;  %s1565_s13 = sphi %s1603_s13, %s1959_s13   ;;  %s1561_s12 = sphi %s1601_s12, %s1958_s12   ;;  %s1557_s11 = sphi %s1599_s11, %s1957_s11   ;;  %s1553_s10 = sphi %s1597_s10, %s1956_s10   ;;  %s1549_s9 = sphi %s1595_s9, %s1955_s9  }
   0x8   : > { %s47_s17 = sadd.s32 1, %s1557_s11  ;;  %p54_p0 = scmp.ne.s32.totalorder %s1557_s11, %s1553_s10 }
   0x9   : > { %p55_p1 = scmp.eq.s32.totalorder %s1569_s14, 0  ;;  %p60_p2 = scmp.ne.s32.totalorder %s1553_s10, %s1549_s9 }
   0xa   : > { %p1633_p3 = scmp.eq.s32.totalorder %s980_s15, 0  ;;  %p114_p4 = scmp.eq.s32.totalorder %s980_s15, 2 }
   0xb   : > { %p1637_p5 = por %p55_p1, %p54_p0  ;;  %p120_p6 = scmp.eq.s32.totalorder %s981_s16, 2 }
   0xc   : > { %s1938_s18 = scalar_select %p1633_p3, 1, 0 }
   0xd   : > { %p1643_p7 = por %p1633_p3, %p60_p2  ;;  %p1647_p8 = por %p114_p4, %p54_p0 }
   0xe   : > { %p1651_p9 = por %p120_p6, %p60_p2  ;;  %p982_p10 = scmp.ge.s32.totalorder %s1569_s14, 1 }
   0xf   : > { %s1940_s20 = scalar_select %p1643_p7, 1, 0 }
  0x10   : > { %s1941_s21 = scalar_select %p1647_p8, 1, 0 }
  0x11   : > { %s1942_s22 = scalar_select %p1651_p9, 1, 0 }
  0x12   : > { %p127_p11 = scmp.lt.s32.totalorder %s1569_s14, 4  ;;  %s1571_s24 = smov [#allocation5]  }
  0x13   : > { %s142_s25 = sshll.u32 %s1571_s24, 4  ;;  %p1319_p13 = scmp.lt.s32.totalorder %s1569_s14, 3  ;;  %s143_s25 = int_to_ptr.vmem [resolvable:$true] %s142_s25 }
  0x14   : > { %p1657_p12 = pnand %p982_p10, %p127_p11  ;;  %s38_s28 = sadd.s32 1, %s1565_s13 }
  0x15   : > { %p1666_p1 = pnand %p1319_p13, %p1637_p5  ;;  %p1677_p4 = scmp.ge.s32.totalorder %s38_s28, 3 }
  0x16   : > { %s1943_s23 = scalar_select %p1657_p12, 1, 0 }
  0x17   : > { %p1306_p0 = pneg %p1657_p12  ;;  %s153_s30 = sand.u32 1, %s1557_s11  }
  0x18   : > { %s1944_s26 = scalar_select %p1666_p1, 1, 0 }
  0x19   : > { %p1672_p2 = pnand %p1306_p0, %p1633_p3  ;;  %s1425_s5 = scalar_lea.hbm %s1930_s1, 64 }
  0x1a   : > { %s1946_s29 = scalar_select %p1677_p4, 1, 0 }
  0x1b   : > { %p1426_p5 = scmp.ne.s32.totalorder %s1930_s1, %s1425_s5  ;;  %p1427_p6 = pneg %p1672_p2 }
  0x1c   : > { %p1432_p13 = scmp.lt.u32.totalorder %s1425_s5, %s1930_s1 }
  0x1d   : > { %p1428_p10 = pnand %p1427_p6, %p1426_p5 }
  0x1f   : > { %p1429_p11 = pneg %p1428_p10 }
  0x21   : > { %p1434_p0 = pnand %p1432_p13, %p1429_p11 }
  0x23   : > { %1437 = shalt.err (!%p1434_p0)
}
  0x24   : > { %s1438_s16 = scalar_lea.vmem %s143_s25, 64  ;;  %p1446_p7 = scmp.lt.s32.totalorder %s143_s25, %s143_s25 }
  0x25   : > { %p1439_p9 = scmp.ne.s32.totalorder %s143_s25, %s1438_s16  ;;  %p1447_p12 = scmp.lt.s32.totalorder %s1438_s16, %s1438_s16 }
  0x27   : > { %p1441_p8 = pnand %p1439_p9, %p1427_p6  ;;  %p1448_p1 = por %p1447_p12, %p1446_p7 }
  0x29   : > { %p1442_p3 = pneg %p1441_p8 }
  0x2b   : > { %p1449_p4 = pnand %p1448_p1, %p1442_p3 }
  0x2d   : > { %1452 = shalt.err (!%p1449_p4)
}
  0x2e   : > { %1309 = dma.hbm_to_vmem [thread:$0]  (!%p1672_p2), %s1930_s1, 64, %s143_s25, [#allocation6]  }
  0x2f   : > { %p1947_p9 = scmp.ne.s32.totalorder %s1946_s29, 0  ;;  %s1295_s3 = smul.u32 384, %s153_s30 }
  0x30   : > { %s1296_s5 = smul.u32 6144, %s1565_s13  ;;  %s1717_s29 = scalar_lea.sflag [#allocation3], %s153_s30 }
  0x31   : > { %s1961_s28 = smov (%p1947_p9, %s38_s28), 0  ;;  %s157_s8 = scalar_lea.vmem [#allocation2], %s1295_s3 }
  0x32   : > { %s42_s4 = ssub.s32 %s1565_s13, %s1961_s28  ;;  %s1708_s7 = scalar_lea.hbm %s1929_s0, %s1296_s5 }
  0x33   : > { %p45_p3 = scmp.eq.s32.totalorder %s42_s4, 0  ;;  %s165_s15 = sshll.u32 %s157_s8, 4  ;;  %s1715_s15 = int_to_ptr.vmem [resolvable:$true] %s165_s15 }
  0x34   : > { %s1453_s16 = scalar_lea.hbm %s1708_s7, 6144  ;;  %p1948_p8 = scmp.ne.s32.totalorder %s1944_s26, 0 }
  0x35   : > { %s1713_s25 = scalar_select %p45_p3, %s1557_s11, %s47_s17  }
  0x36   : > { %p1454_p7 = scmp.ne.s32.totalorder %s1708_s7, %s1453_s16  ;;  %p1455_p12 = pneg %p1948_p8 }
  0x37   : > { %s1458_s3 = scalar_lea.hbm %s1929_s0, 18432  ;;  %p1459_p4 = scmp.lt.u32.totalorder %s1708_s7, %s1929_s0 }
  0x38   : > { %p1456_p1 = pnand %p1455_p12, %p1454_p7  ;;  %p1460_p5 = scmp.lt.u32.totalorder %s1458_s3, %s1453_s16 }
  0x39   : > { %p1462_p10 = scmp.lt.u32.totalorder %s1453_s16, %s1708_s7 }
  0x3a   : > { %p1457_p2 = pneg %p1456_p1  ;;  %p1461_p6 = por %p1460_p5, %p1459_p4 }
  0x3c   : > { %p1463_p11 = por %p1462_p10, %p1461_p6 }
  0x3e   : > { %p1464_p13 = pnand %p1463_p11, %p1457_p2 }
  0x40   : > { %1467 = shalt.err (!%p1464_p13)
}
  0x41   : > { %s1468_s17 = scalar_lea.vmem %s1715_s15, 6144  ;;  %s1572_s30 = smov [#allocation2]  }
  0x42   : > { %p1469_p0 = scmp.ne.s32.totalorder %s1715_s15, %s1468_s17  ;;  %s1473_s27 = sshll.u32 %s1572_s30, 4  ;;  %s1474_s27 = int_to_ptr.vmem [resolvable:$false] %s1473_s27 }
  0x43   : > { %s1475_s6 = scalar_lea.vmem %s1474_s27, 12288  ;;  %p1476_p7 = scmp.lt.s32.totalorder %s1715_s15, %s1474_s27 }
  0x44   : > { %p1471_p9 = pnand %p1469_p0, %p1455_p12  ;;  %p1477_p1 = scmp.lt.s32.totalorder %s1475_s6, %s1468_s17 }
  0x46   : > { %p1472_p3 = pneg %p1471_p9  ;;  %p1478_p4 = por %p1477_p1, %p1476_p7 }
  0x48   : > { %p1479_p5 = pnand %p1478_p4, %p1472_p3 }
  0x4a   : > { %1482 = shalt.err (!%p1479_p5)
}
  0x4b   : > { %s1573_s8 = smov 64   ;;  %s1574_s16 = smov 4  }
  0x4c   : > { %1313 = dma.hbm_to_vmem [thread:$0]  (!%p1948_p8), %s1708_s7, 6144, %s1715_s15, %s1717_s29, %s1573_s8, %s1573_s8, %s1574_s16  }
  0x4d   : > { %p1949_p12 = scmp.ne.s32.totalorder %s1943_s23, 0 }
  0x4e   : > { %s1748_s19 = sand.u32 (!%p1949_p12), 1, %s1553_s10   ;;  %p1950_p2 = scmp.ne.s32.totalorder (!%p1949_p12), %s1940_s20, 0 }
  0x4f   : > { %177 = sbr.rel (%p1949_p12) target bundleno = 580 (0x244), region = 28  ;;  %s180_s3 = scalar_lea.sflag (!%p1949_p12), [#allocation3], %s1748_s19 }
  0x50   : > { %s1297_s24 = smul.u32 (!%p1949_p12), 384, %s1748_s19 }
  0x52   : > { %s1752_s4 = scalar_lea.vmem (!%p1949_p12), [#allocation2], %s1297_s24 }
  0x56   : > { %1536 = dma.done.wait (%p1950_p2), %s180_s3, 6144  }
  0x57   : > { %1538 = vsyncadd (%p1950_p2), %s180_s3, 4294961152  ;;  %p1951_p8 = scmp.ne.s32.totalorder %s1938_s18, 0 }
  0x59   : > { %1540 = dma.done.wait (%p1951_p8), [#allocation6], 64  }
  0x5a   : > { %1542 = vsyncadd (%p1951_p8), [#allocation6], 4294967232  ;;  %v1575_v0 = vmov 0.0   ;;  %vm1576_vm0 = vmmov 0   ;;  %v1377_v1 = vld [vmem:[%s1752_s4] sm:$0xff]   ;;  %v1378_v2 = vld [vmem:[%s1752_s4 + $0x8] sm:$0xff]  }
  0x5b   : > { %1175 = vmatprep.subr.bf16.mxu0 %v1575_v0  ;;  %1195 = vmatprep.subr.bf16.mxu1 %v1575_v0  ;;  %v1380_v3 = vld [vmem:[%s1752_s4 + $0x40] sm:$0xff]   ;;  %v1382_v4 = vld [vmem:[%s1752_s4 + $0x48] sm:$0xff]   ;;  %v1379_v5 = vld [vmem:[%s1752_s4 + $0x10] sm:$0xff]   ;;  %p752_p6 = scmp.eq.s32.totalorder %s1561_s12, 1  ;;  %p753_p10 = scmp.eq.s32.totalorder %s1561_s12, 2 }
  0x5c   : > { %1191 = vmatprep.mubr.msk.bf16.mxu0 %vm1576_vm0, %v1575_v0  ;;  %1211 = vmatprep.mubr.msk.bf16.mxu1 %vm1576_vm0, %v1575_v0  ;;  %v1384_v6 = vld [vmem:[%s1752_s4 + $0x50] sm:$0xff]   ;;  %v1381_v7 = vld [vmem:[%s1752_s4 + $0x18] sm:$0xff]   ;;  %v1383_v9 = vld [vmem:[%s1752_s4 + $0x20] sm:$0xff]   ;;  %s988_s20 = sshll.u32 %s1748_s19, 3 }
  0x5d   : > { %1176 = vmatpush3.bf16.msra.mxu0 %v1377_v1  ;;  %1196 = vmatpush3.bf16.msra.mxu1 %v1380_v3  ;;  %v1386_v8 = vld [vmem:[%s1752_s4 + $0x58] sm:$0xff]   ;;  %v1388_v10 = vld [vmem:[%s1752_s4 + $0x60] sm:$0xff]   ;;  %v1385_v11 = vld [vmem:[%s1752_s4 + $0x28] sm:$0xff]   ;;  %p1861_p11 = por %p753_p10, %p752_p6  ;;  %s1866_s23 = scalar_lea.vmem [#allocation7], %s988_s20 }
  0x5e   : > { %1177 = vmatprep.subr.bf16.mxu0 %v1575_v0  ;;  %1197 = vmatprep.subr.bf16.mxu1 %v1575_v0  ;;  %v1390_v12 = vld [vmem:[%s1752_s4 + $0x68] sm:$0xff]   ;;  %v1387_v13 = vld [vmem:[%s1752_s4 + $0x30] sm:$0xff]   ;;  %v1389_v15 = vld [vmem:[%s1752_s4 + $0x38] sm:$0xff]   ;;  %vm1578_vm1 = vmmov (%p1861_p11), 0  }
  0x5f   : > { %v1392_v14 = vld [vmem:[%s1752_s4 + $0x70] sm:$0xff]   ;;  %v1796_v16 = vld [vmem:[#allocation5] sm:$0xf]  ;;  %v1394_v17 = vld [vmem:[%s1752_s4 + $0x78] sm:$0xff]  }
  0x60   : > { %v1391_v18 = vld [vmem:[%s1752_s4 + $0x80] sm:$0xff]   ;;  %v1393_v20 = vld [vmem:[%s1752_s4 + $0x88] sm:$0xff]   ;;  %v1395_v22 = vld [vmem:[%s1752_s4 + $0x90] sm:$0xff]  }
  0x61   : > { %1178 = vmatpush3.bf16.msra.mxu0 %v1378_v2  ;;  %1198 = vmatpush3.bf16.msra.mxu1 %v1382_v4  ;;  %v1396_v19 = vld [vmem:[%s1752_s4 + $0xc0] sm:$0xff]   ;;  %v1398_v21 = vld [vmem:[%s1752_s4 + $0xc8] sm:$0xff]   ;;  %v1400_v23 = vld [vmem:[%s1752_s4 + $0xd0] sm:$0xff]  }
  0x62   : > { %1179 = vmatprep.subr.bf16.mxu0 %v1575_v0  ;;  %1199 = vmatprep.subr.bf16.mxu1 %v1575_v0  ;;  %v1397_v24 = vld [vmem:[%s1752_s4 + $0x98] sm:$0xff]   ;;  %v1399_v26 = vld [vmem:[%s1752_s4 + $0xa0] sm:$0xff]   ;;  %v1401_v28 = vld [vmem:[%s1752_s4 + $0xa8] sm:$0xff]  }
  0x63   : > { %v1402_v25 = vld [vmem:[%s1752_s4 + $0xd8] sm:$0xff]   ;;  %v1404_v27 = vld [vmem:[%s1752_s4 + $0xe0] sm:$0xff]   ;;  %v1406_v29 = vld [vmem:[%s1752_s4 + $0xe8] sm:$0xff]  }
  0x64   : > { %v1403_v30 = vld [vmem:[%s1752_s4 + $0xb0] sm:$0xff]   ;;  %v1405_v32 = vld [vmem:[%s1752_s4 + $0xb8] sm:$0xff]   ;;  %v1407_v34 = vld [vmem:[%s1752_s4 + $0x100] sm:$0xff]  }
  0x65   : > { %1180 = vmatpush3.bf16.msra.mxu0 %v1379_v5  ;;  %1200 = vmatpush3.bf16.msra.mxu1 %v1384_v6  ;;  %v1408_v31 = vld [vmem:[%s1752_s4 + $0xf0] sm:$0xff]   ;;  %v1410_v33 = vld [vmem:[%s1752_s4 + $0xf8] sm:$0xff]   ;;  %v1409_v35 = vld [vmem:[%s1752_s4 + $0x108] sm:$0xff]  }
  0x66   : > { %1181 = vmatprep.subr.bf16.mxu0 %v1575_v0  ;;  %1201 = vmatprep.subr.bf16.mxu1 %v1575_v0  ;;  %v1411_v36 = vld [vmem:[%s1752_s4 + $0x110] sm:$0xff]   ;;  %v1412_v37 = vld [vmem:[%s1752_s4 + $0x118] sm:$0xff]   ;;  %v1413_v38 = vld [vmem:[%s1752_s4 + $0x120] sm:$0xff]  }
  0x67   : > { %v1414_v39 = vld [vmem:[%s1752_s4 + $0x128] sm:$0xff]   ;;  %v1415_v40 = vld [vmem:[%s1752_s4 + $0x130] sm:$0xff]   ;;  %v1416_v41 = vld [vmem:[%s1752_s4 + $0x138] sm:$0xff]  }
  0x69   : > { %1182 = vmatpush3.bf16.msra.mxu0 %v1381_v7  ;;  %1202 = vmatpush3.bf16.msra.mxu1 %v1386_v8  ;;  %v1417_v7 = vld [vmem:[%s1752_s4 + $0x140] sm:$0xff] (%p1861_p11)   ;;  %v1577_v8 = vmov (%p1861_p11), 0.0  }
  0x6a   : > { %1183 = vmatprep.subr.bf16.mxu0 %v1575_v0  ;;  %1203 = vmatprep.subr.bf16.mxu1 %v1575_v0 }
  0x6d   : > { %1184 = vmatpush3.bf16.msra.mxu0 %v1383_v9  ;;  %1204 = vmatpush3.bf16.msra.mxu1 %v1388_v10  ;;  %v1418_v9 = vld [vmem:[%s1752_s4 + $0x148] sm:$0xff] (%p1861_p11)   ;;  %v1419_v10 = vld [vmem:[%s1752_s4 + $0x150] sm:$0xff] (%p1861_p11)  }
  0x6e   : > { %1185 = vmatprep.subr.bf16.mxu0 %v1575_v0  ;;  %1205 = vmatprep.subr.bf16.mxu1 %v1575_v0 }
  0x71   : > { %1186 = vmatpush3.bf16.msra.mxu0 %v1385_v11  ;;  %1206 = vmatpush3.bf16.msra.mxu1 %v1390_v12  ;;  %v1420_v11 = vld [vmem:[%s1752_s4 + $0x158] sm:$0xff] (%p1861_p11)   ;;  %v1421_v12 = vld [vmem:[%s1752_s4 + $0x160] sm:$0xff] (%p1861_p11)  }
  0x72   : > { %1187 = vmatprep.subr.bf16.mxu0 %v1575_v0  ;;  %1207 = vmatprep.subr.bf16.mxu1 %v1575_v0 }
  0x75   : > { %1188 = vmatpush3.bf16.msra.mxu0 %v1387_v13  ;;  %1208 = vmatpush3.bf16.msra.mxu1 %v1392_v14  ;;  %v1422_v13 = vld [vmem:[%s1752_s4 + $0x168] sm:$0xff] (%p1861_p11)   ;;  %v1423_v14 = vld [vmem:[%s1752_s4 + $0x170] sm:$0xff] (%p1861_p11)  }
  0x76   : > { %1189 = vmatprep.subr.bf16.mxu0 %v1575_v0  ;;  %1209 = vmatprep.subr.bf16.mxu1 %v1575_v0 }
  0x79   : > { %1190 = vmatpush3.bf16.msra.mxu0 %v1389_v15  ;;  %1210 = vmatpush3.bf16.msra.mxu1 %v1394_v17  ;;  %v1424_v15 = vld [vmem:[%s1752_s4 + $0x178] sm:$0xff] (%p1861_p11)  }
  0x7a   : > { %1215 = vmatprep.subr.bf16.mxu0 %v1575_v0  ;;  %1235 = vmatprep.subr.bf16.mxu1 %v1575_v0 }
  0x7c   : > { %1192 = vmatmul.mubr.bf16.vlgmr.msra.gmra.mrb[0].mxu0 %v1796_v16  ;;  %1212 = vmatmul.mubr.bf16.vlgmr.msra.gmra.mrb[0].mxu1 %v1796_v16 }
  0x7d   : > { %1216 = vmatpush3.bf16.msra.mxu0 %v1391_v18  ;;  %1231 = vmatprep.mubr.msk.bf16.mxu0 %vm1576_vm0, %v1575_v0 }
  0x7e   : > { %1217 = vmatprep.subr.bf16.mxu0 %v1575_v0  ;;  %1236 = vmatpush3.bf16.msra.mxu1 %v1396_v19 }
  0x7f   : > { %1251 = vmatprep.mubr.msk.bf16.mxu1 %vm1576_vm0, %v1575_v0  ;;  %1237 = vmatprep.subr.bf16.mxu1 %v1575_v0 }
  0x81   : > { %1218 = vmatpush3.bf16.msra.mxu0 %v1393_v20 }
  0x82   : > { %1219 = vmatprep.subr.bf16.mxu0 %v1575_v0  ;;  %1238 = vmatpush3.bf16.msra.mxu1 %v1398_v21 }
  0x83   : > { %1239 = vmatprep.subr.bf16.mxu1 %v1575_v0 }
  0x85   : > { %1220 = vmatpush3.bf16.msra.mxu0 %v1395_v22 }
  0x86   : > { %1221 = vmatprep.subr.bf16.mxu0 %v1575_v0  ;;  %1240 = vmatpush3.bf16.msra.mxu1 %v1400_v23 }
  0x87   : > { %1241 = vmatprep.subr.bf16.mxu1 %v1575_v0 }
  0x89   : > { %1222 = vmatpush3.bf16.msra.mxu0 %v1397_v24 }
  0x8a   : > { %1223 = vmatprep.subr.bf16.mxu0 %v1575_v0  ;;  %1242 = vmatpush3.bf16.msra.mxu1 %v1402_v25 }
  0x8b   : > { %1243 = vmatprep.subr.bf16.mxu1 %v1575_v0 }
  0x8d   : > { %1224 = vmatpush3.bf16.msra.mxu0 %v1399_v26 }
  0x8e   : > { %1225 = vmatprep.subr.bf16.mxu0 %v1575_v0  ;;  %1244 = vmatpush3.bf16.msra.mxu1 %v1404_v27 }
  0x8f   : > { %1245 = vmatprep.subr.bf16.mxu1 %v1575_v0 }
  0x91   : > { %1226 = vmatpush3.bf16.msra.mxu0 %v1401_v28 }
  0x92   : > { %1227 = vmatprep.subr.bf16.mxu0 %v1575_v0  ;;  %1246 = vmatpush3.bf16.msra.mxu1 %v1406_v29 }
  0x93   : > { %1247 = vmatprep.subr.bf16.mxu1 %v1575_v0 }
  0x95   : > { %1228 = vmatpush3.bf16.msra.mxu0 %v1403_v30 }
  0x96   : > { %1229 = vmatprep.subr.bf16.mxu0 %v1575_v0  ;;  %1248 = vmatpush3.bf16.msra.mxu1 %v1408_v31 }
  0x97   : > { %1249 = vmatprep.subr.bf16.mxu1 %v1575_v0 }
  0x99   : > { %1230 = vmatpush3.bf16.msra.mxu0 %v1405_v32 }
  0x9a   : > { %1255 = vmatprep.subr.bf16.mxu0 %v1575_v0  ;;  %1250 = vmatpush3.bf16.msra.mxu1 %v1410_v33 }
  0x9c   : > { %1232 = vmatmul.mubr.bf16.vlgmr.msra.gmra.mrb[4].mxu0 %v1796_v16 }
  0x9d   : > { %1256 = vmatpush3.bf16.msra.mxu0 %v1407_v34  ;;  %1271 = vmatprep.mubr.msk.bf16.mxu0 %vm1576_vm0, %v1575_v0 }
  0x9e   : > { %1257 = vmatprep.subr.bf16.mxu0 %v1575_v0  ;;  %1252 = vmatmul.mubr.bf16.vlgmr.msra.gmra.mrb[4].mxu1 %v1796_v16 }
  0xa1   : > { %1258 = vmatpush3.bf16.msra.mxu0 %v1409_v35 }
  0xa2   : > { %1259 = vmatprep.subr.bf16.mxu0 %v1575_v0 }
  0xa5   : > { %1260 = vmatpush3.bf16.msra.mxu0 %v1411_v36 }
  0xa6   : > { %1261 = vmatprep.subr.bf16.mxu0 %v1575_v0 }
  0xa9   : > { %1262 = vmatpush3.bf16.msra.mxu0 %v1412_v37 }
  0xaa   : > { %1263 = vmatprep.subr.bf16.mxu0 %v1575_v0 }
  0xad   : > { %1264 = vmatpush3.bf16.msra.mxu0 %v1413_v38 }
  0xae   : > { %1265 = vmatprep.subr.bf16.mxu0 %v1575_v0 }
  0xb1   : > { %1266 = vmatpush3.bf16.msra.mxu0 %v1414_v39 }
  0xb2   : > { %1267 = vmatprep.subr.bf16.mxu0 %v1575_v0 }
  0xb5   : > { %1268 = vmatpush3.bf16.msra.mxu0 %v1415_v40 }
  0xb6   : > { %1269 = vmatprep.subr.bf16.mxu0 %v1575_v0 }
  0xb9   : > { %1270 = vmatpush3.bf16.msra.mxu0 %v1416_v41 }
  0xba   : > { %1275 = vmatprep.subr.bf16.mxu0 (%p1861_p11), %v1577_v8 }
  0xbc   : > { %1272 = vmatmul.mubr.bf16.vlgmr.msra.gmra.mrb[8].mxu0 %v1796_v16 }
  0xbd   : > { %1276 = vmatpush3.bf16.msra.mxu0 (%p1861_p11), %v1417_v7  ;;  %1291 = vmatprep.mubr.msk.bf16.mxu0 (%p1861_p11), %vm1578_vm1, %v1577_v8 }
  0xbe   : > { %1277 = vmatprep.subr.bf16.mxu0 (%p1861_p11), %v1577_v8 }
  0xc1   : > { %1278 = vmatpush3.bf16.msra.mxu0 (%p1861_p11), %v1418_v9 }
  0xc2   : > { %1279 = vmatprep.subr.bf16.mxu0 (%p1861_p11), %v1577_v8 }
  0xc5   : > { %1280 = vmatpush3.bf16.msra.mxu0 (%p1861_p11), %v1419_v10 }
  0xc6   : > { %1281 = vmatprep.subr.bf16.mxu0 (%p1861_p11), %v1577_v8 }
  0xc9   : > { %1282 = vmatpush3.bf16.msra.mxu0 (%p1861_p11), %v1420_v11 }
  0xca   : > { %1283 = vmatprep.subr.bf16.mxu0 (%p1861_p11), %v1577_v8 }
  0xcd   : > { %1284 = vmatpush3.bf16.msra.mxu0 (%p1861_p11), %v1421_v12 }
  0xce   : > { %1285 = vmatprep.subr.bf16.mxu0 (%p1861_p11), %v1577_v8 }
  0xd1   : > { %1286 = vmatpush3.bf16.msra.mxu0 (%p1861_p11), %v1422_v13 }
  0xd2   : > { %1287 = vmatprep.subr.bf16.mxu0 (%p1861_p11), %v1577_v8 }
  0xd5   : > { %1288 = vmatpush3.bf16.msra.mxu0 (%p1861_p11), %v1423_v14 }
  0xd6   : > { %1289 = vmatprep.subr.bf16.mxu0 (%p1861_p11), %v1577_v8 }
  0xd9   : > { %1290 = vmatpush3.bf16.msra.mxu0 (%p1861_p11), %v1424_v15 }
 0x14f   : > { %v308_v42 = vpop.f32.mrb[0].mxu0  ;;  %v416_v47 = vpop.f32.mrb[0].mxu1 }
 0x150   : > { %v1193_v43 = vpop.f32.mrb[1].mxu0  ;;  %v314_v44 = vand.u32 2147483647, %v308_v42  ;;  %v422_v48 = vand.u32 2147483647, %v416_v47  ;;  %v1213_v49 = vpop.f32.mrb[1].mxu1 }
 0x151   : > { %v311_v45 = vpop.f32.mrb[2].mxu0  ;;  %v419_v50 = vpop.f32.mrb[2].mxu1 }
 0x152   : > { %v1194_v46 = vpop.f32.mrb[3].mxu0  ;;  %v423_v51 = vadd.f32 %v422_v48, %v314_v44  ;;  %v1214_v52 = vpop.f32.mrb[3].mxu1  ;;  %1292 = vmatmul.mubr.bf16.vlgmr.msra.gmra.mrb[0].mxu0 (%p1861_p11), %v1796_v16 }
 0x16f   : > { %v525_v53 = vpop.f32.mrb[4].mxu0 }
 0x170   : > { %v531_v54 = vand.u32 2147483647, %v525_v53  ;;  %v1233_v55 = vpop.f32.mrb[5].mxu0 }
 0x171   : > { %v528_v56 = vpop.f32.mrb[6].mxu0  ;;  %v634_v59 = vpop.f32.mrb[4].mxu1 }
 0x172   : > { %v532_v57 = vadd.f32 %v531_v54, %v423_v51  ;;  %v1234_v58 = vpop.f32.mrb[7].mxu0  ;;  %v640_v60 = vand.u32 2147483647, %v634_v59  ;;  %v1253_v61 = vpop.f32.mrb[5].mxu1 }
 0x173   : > { %v637_v62 = vpop.f32.mrb[6].mxu1 }
 0x174   : > { %v641_v63 = vadd.f32 %v640_v60, %v532_v57  ;;  %v1254_v0 = vpop.f32.mrb[7].mxu1 }
 0x18e   : > { %757 = sbr.rel (!%p1861_p11) target bundleno = 555 (0x22b), region = 40 }
 0x18f   : > { %v743_v1 = vpop.f32.mrb[8].mxu0 }
 0x190   : > { %v749_v2 = vand.u32 2147483647, %v743_v1  ;;  %v1273_v3 = vpop.f32.mrb[9].mxu0 }
 0x191   : > { %v746_v4 = vpop.f32.mrb[10].mxu0 }
 0x192   : > { %v750_v5 = vadd.f32 %v749_v2, %v641_v63  ;;  %v1274_v6 = vpop.f32.mrb[11].mxu0 }
 0x194   : > { %751 = vst [vmem:[%s1866_s23] sm:$0xff] %v750_v5 }
 0x19b   : > { %v758_v17 = vld [vmem:[%s1866_s23] sm:$0xff] }
 0x225   : > { %v858_v18 = vpop.f32.mrb[0].mxu0 }
 0x226   : > { %v864_v19 = vand.u32 2147483647, %v858_v18  ;;  %v1293_v20 = vpop.f32.mrb[1].mxu0 }
 0x227   : > { %v861_v21 = vpop.f32.mrb[2].mxu0 }
 0x228   : > { %v865_v22 = vadd.f32 %v864_v19, %v758_v17  ;;  %v1294_v23 = vpop.f32.mrb[3].mxu0 }
 0x22a   : > { %866 = vst [vmem:[%s1866_s23] sm:$0xff] %v865_v22 }
 0x22b PF: > { %s1118_s26 = sshll.u32 %s1561_s12, 7  ;;  %s883_s5 = sshll.u32 %s1866_s23, 4  ;;  %s884_s5 = int_to_ptr.vmem [resolvable:$true] %s883_s5 }
 0x22c   : > { %s1886_s29 = scalar_lea.hbm %s1931_s2, %s1118_s26  ;;  %s868_s17 = scalar_lea.sflag [#allocation4], %s1748_s19 }
 0x22d   : > { %s1483_s30 = scalar_lea.vmem %s884_s5, 128  ;;  %p1953_p0 = scmp.ne.s32.totalorder %s1941_s21, 0 }
 0x22e   : > { %p1484_p13 = scmp.ne.s32.totalorder %s884_s5, %s1483_s30  ;;  %s1579_s27 = smov [#allocation7]  }
 0x22f   : > { %s1487_s6 = sshll.u32 %s1579_s27, 4  ;;  %s1488_s6 = int_to_ptr.vmem [resolvable:$false] %s1487_s6 }
 0x230   : > { %p1485_p9 = pnand %p1484_p13, %p1953_p0  ;;  %s1489_s8 = scalar_lea.vmem %s1488_s6, 256 }
 0x231   : > { %p1490_p7 = scmp.lt.s32.totalorder %s884_s5, %s1488_s6  ;;  %p1491_p1 = scmp.lt.s32.totalorder %s1489_s8, %s1483_s30 }
 0x232   : > { %p1486_p3 = pneg %p1485_p9 }
 0x233   : > { %p1492_p4 = por %p1491_p1, %p1490_p7 }
 0x235   : > { %p1493_p5 = pnand %p1492_p4, %p1486_p3 }
 0x237   : > { %1496 = shalt.err (!%p1493_p5)
}
 0x238   : > { %s1497_s12 = scalar_lea.hbm %s1886_s29, 128  ;;  %s1501_s24 = scalar_lea.hbm %s1931_s2, 384 }
 0x239   : > { %p1498_p12 = scmp.ne.s32.totalorder %s1886_s29, %s1497_s12  ;;  %p1502_p6 = scmp.lt.u32.totalorder %s1886_s29, %s1931_s2 }
 0x23a   : > { %p1503_p10 = scmp.lt.u32.totalorder %s1501_s24, %s1497_s12  ;;  %p1505_p13 = scmp.lt.u32.totalorder %s1497_s12, %s1886_s29 }
 0x23b   : > { %p1499_p2 = pnand %p1498_p12, %p1953_p0 }
 0x23c   : > { %p1504_p11 = por %p1503_p10, %p1502_p6 }
 0x23d   : > { %p1500_p8 = pneg %p1499_p2 }
 0x23e   : > { %p1506_p9 = por %p1505_p13, %p1504_p11 }
 0x240   : > { %p1507_p3 = pnand %p1506_p9, %p1500_p8 }
 0x242   : > { %1510 = shalt.err (!%p1507_p3)
}
 0x243   : > { %1304 = dma.vmem_to_hbm [thread:$0]  (%p1953_p0), %s884_s5, 128, %s1886_s29, %s868_s17  }
 0x244 PF: > { %p1321_p7 = scmp.ge.s32.totalorder %s1569_s14, 2  ;;  %s895_s18 = sand.u32 1, %s1549_s9  }
 0x245   : > { %p1954_p1 = scmp.ne.s32.totalorder %s1942_s22, 0  ;;  %s896_s20 = scalar_lea.sflag [#allocation4], %s895_s18 }
 0x247   : > { %p1315_p4 = pnand %p1321_p7, %p1954_p1 }
 0x249   : > { %1544 = dma.done.wait (!%p1315_p4), %s896_s20, 128  }
 0x24a   : > { %1546 = vsyncadd (!%p1315_p4), %s896_s20, 4294967168  ;;  %s19_s14 = sadd.s32 1, %s1569_s14   ;;  %s1955_s9 = smov %s1553_s10 }
 0x24b   : > { %p16_p5 = scmp.ge.s32.totalorder %s19_s14, 5   ;;  %s1956_s10 = smov %s1557_s11 }
 0x24c   : > { %s1957_s11 = smov %s1713_s25  ;;  %s1958_s12 = smov %s1565_s13 }
 0x24d   : > { %s1959_s13 = smov %s1961_s28  ;;  %18 = sbr.rel (!%p16_p5) target bundleno = 7 (0x7), region = 87 }
 0x254   :  { %901 = vsyncpa [#allocation3], 1 }
 0x255   :  { %903 = vsyncpa [#allocation3 + $0x1], 1 }
 0x256   :  { %904 = vsyncpa [#allocation6], 1 }
 0x257   :  { %905 = vsyncpa [#allocation4], 1 }
 0x258   :  { %907 = vsyncpa [#allocation4 + $0x1], 1 }

</bundles_post_ra>
